<compile_context>
chip_gen: v7x
topology: tpu7x:2x2x1
jax: 0.10.0
libtpu: 0.0.40
codegen_flags: <defaults>
</compile_context>

<pallas_src>
import jax
import jax.numpy as jnp
from jax import lax
from jax.experimental import pallas as pl
from jax.experimental.pallas import tpu as pltpu


def _choose_tiles(m, out_dim, kf, eps_itemsize):
    """Pick (tm, to) tiles for the (batch, out) grid."""
    # Output tile width: lane-dense (>=128) when out_dim allows, else full extent
    # (full-extent last dims are exempt from the 128-lane divisibility rule).
    if out_dim <= 256:
        to = out_dim
    elif out_dim % 128 == 0:
        to = 256
    else:
        to = 128  # ragged tail block; OOB output elements are dropped by Pallas
    # Batch tile: largest multiple of 8 keeping one eps tile around <= 2 MiB so
    # double-buffered eps + the f32 temporaries stay far below the VMEM limit.
    budget = 2 * 1024 * 1024
    tm = budget // max(1, to * kf * eps_itemsize)
    tm = max(8, min(128, (tm // 8) * 8))
    if m <= tm:
        tm = m  # full extent along batch
    return tm, to
    # Note: for very large in_dim (kf*to*8*2B > ~8 MiB) a feature (k) grid axis
    # with a VMEM f32 accumulator would be the next step; not needed at these sizes.


def _bnn_linear_kernel(x_ref, mu_ref, sig_ref, eps_ref, o_ref):
    # x_ref:   (tm, kf)        augmented input tile (f32), kf = in_dim + 1
    # mu_ref:  (to, kf)        weight means (f32)
    # sig_ref: (to, kf)        sqrt(var), precomputed in the wrapper (f32)
    # eps_ref: (tm, to, kf)    standard-normal samples (bf16 or f32)
    # o_ref:   (tm, to)        h = x_aug @ (mu + sig*eps)^T, per sample
    x = x_ref[...]                                       # (tm, kf)
    mu = mu_ref[...]                                     # (to, kf)
    sig = sig_ref[...]                                   # (to, kf)
    eps = eps_ref[...].astype(jnp.float32)               # (tm, to, kf)

    # Mean term on the MXU: x @ mu^T (contract feature dims; no transpose op).
    mean = lax.dot_general(x, mu, (((1,), (1,)), ((), ())),
                           preferred_element_type=jnp.float32)      # (tm, to)

    # Noise term on the VPU: sum_k x[b,k] * sig[o,k] * eps[b,o,k].
    noise = jnp.sum((x[:, None, :] * sig[None, :, :]) * eps, axis=-1)  # (tm, to)

    o_ref[...] = (mean + noise).astype(o_ref.dtype)


def bnn_linear_forward(x, mu, var, eps, shape, *, tm=None, to=None):
    """Forward pass of BNNLinear (diagonal covariance branch).

    x:   [batch, ...]                 (flattened to [batch, shape])
    mu:  [out_dim, in_dim+1]          weight means (bias column included)
    var: [out_dim, in_dim+1]          elementwise variances (> 0)
    eps: [batch, out_dim, in_dim+1]   standard-normal samples (torch.randn
                                      analog; bf16 recommended — it is the
                                      dominant HBM stream)
    """
    m = x.shape[0]
    out_dim, kf = mu.shape                      # kf == in_dim + 1

    x2 = jnp.reshape(x, (m, shape)).astype(jnp.float32)
    # Bias column of ones (torch.cat([x, ones], 1)).  x is the tiny stream, so
    # this extra copy is negligible; eps itself is never padded or copied.
    x_aug = jnp.concatenate([x2, jnp.ones((m, 1), jnp.float32)], axis=1)  # (m, kf)

    mu_f = mu.astype(jnp.float32)
    sig_f = jnp.sqrt(var.astype(jnp.float32))   # hoisted sqrt (assumes var > 0,
                                                # same as torch.sqrt in the module)

    a_tm, a_to = _choose_tiles(m, out_dim, kf, jnp.dtype(eps.dtype).itemsize)
    tm = a_tm if tm is None else tm
    to = a_to if to is None else to

    grid = (pl.cdiv(m, tm), pl.cdiv(out_dim, to))

    bytes_accessed = int(eps.size) * jnp.dtype(eps.dtype).itemsize \
        + int(x_aug.size) * 4 + 2 * int(mu_f.size) * 4 + m * out_dim * 4
    cost = pl.CostEstimate(flops=5 * m * out_dim * kf,
                           transcendentals=0,
                           bytes_accessed=int(bytes_accessed))

    # TODO(synk): non-diagonal covariance branch (torch.bmm(sqrt(var), E^T) with
    # 3/4-D var) is not implemented; parameter shapes here imply the diagonal path.
    return pl.pallas_call(
        _bnn_linear_kernel,
        out_shape=jax.ShapeDtypeStruct((m, out_dim), jnp.float32),
        grid=grid,
        in_specs=[
            pl.BlockSpec((tm, kf), lambda i, j: (i, 0)),        # x_aug
            pl.BlockSpec((to, kf), lambda i, j: (j, 0)),        # mu
            pl.BlockSpec((to, kf), lambda i, j: (j, 0)),        # sigma
            pl.BlockSpec((tm, to, kf), lambda i, j: (i, j, 0)),  # eps
        ],
        out_specs=pl.BlockSpec((tm, to), lambda i, j: (i, j)),
        compiler_params=pltpu.CompilerParams(
            dimension_semantics=("parallel", "parallel"),
            vmem_limit_bytes=48 * 1024 * 1024,
        ),
        cost_estimate=cost,
    )(x_aug, mu_f, sig_f, eps)


if __name__ == "__main__":
    key = jax.random.PRNGKey(0)
    k_x, k_mu, k_var, k_eps = jax.random.split(key, 4)

    # Small shapes consistent with the module: batch=16, C=4, H=W=4 -> shape=64.
    batch, C, H, W = 16, 4, 4, 4
    shape = C * H * W            # flattened feature dim (the `shape` arg)
    in_dim = shape               # module adds +1 internally for the bias
    out_dim = 256

    x = jax.random.normal(k_x, (batch, C, H, W), dtype=jnp.float32)
    mu = 0.1 * jax.random.normal(k_mu, (out_dim, in_dim + 1), dtype=jnp.float32)
    var = jax.random.uniform(k_var, (out_dim, in_dim + 1),
                             minval=0.05, maxval=0.5, dtype=jnp.float32)
    # torch.randn analog, generated deterministically outside the kernel and
    # stored in bf16 to halve the dominant HBM stream.
    eps = jax.random.normal(
        k_eps, (batch, out_dim, in_dim + 1), dtype=jnp.float32
    ).astype(jnp.bfloat16)

    # tm=8, to=128 -> grid (2, 2): exercises the tiled, double-buffered path.
    h = bnn_linear_forward(x, mu, var, eps, shape, tm=8, to=128)
    h = jax.block_until_ready(h)

    # Pure-JAX reference of the same math (same bf16 noise samples).
    eps_f32 = eps.astype(jnp.float32)
    x_aug = jnp.concatenate(
        [x.reshape(batch, shape), jnp.ones((batch, 1), jnp.float32)], axis=1)
    w_ref = mu[None] + jnp.sqrt(var)[None] * eps_f32
    h_ref = jnp.einsum('bi,boi->bo', x_aug, w_ref)

    assert h.shape == (batch, out_dim)
    assert jnp.allclose(h, h_ref, atol=2e-2, rtol=2e-2), "mismatch vs reference"
    print("KERNEL_OK")
</pallas_src>

<mosaic_0001>
module attributes {stable_mosaic.version = 11 : i64} {
  func.func @_bnn_linear_kernel(%arg0: i32, %arg1: i32, %arg2: memref<8x65xf32, #tpu.memory_space<vmem>>, %arg3: memref<128x65xf32, #tpu.memory_space<vmem>>, %arg4: memref<128x65xf32, #tpu.memory_space<vmem>>, %arg5: memref<8x128x65xbf16, #tpu.memory_space<vmem>>, %arg6: memref<8x128xf32, #tpu.memory_space<vmem>>) attributes {dimension_semantics = [#tpu.dimension_semantics<parallel>, #tpu.dimension_semantics<parallel>], iteration_bounds = array<i64: 2, 2>, scalar_prefetch = 0 : i64, scratch_operands = 0 : i64, tpu.core_type = #tpu.core_type<tc>, window_params = [{transform_indices = @transform_0, window_bounds = array<i64: 8, 65>}, {transform_indices = @transform_1, window_bounds = array<i64: 128, 65>}, {transform_indices = @transform_2, window_bounds = array<i64: 128, 65>}, {transform_indices = @transform_3, window_bounds = array<i64: 8, 128, 65>}, {transform_indices = @transform_4, window_bounds = array<i64: 8, 128>}]} {
    %c0 = arith.constant 0 : index
    %c0_0 = arith.constant 0 : index
    %0 = vector.load %arg2[%c0, %c0_0] : memref<8x65xf32, #tpu.memory_space<vmem>>, vector<8x65xf32>
    %c0_1 = arith.constant 0 : index
    %c0_2 = arith.constant 0 : index
    %1 = vector.load %arg3[%c0_1, %c0_2] : memref<128x65xf32, #tpu.memory_space<vmem>>, vector<128x65xf32>
    %c0_3 = arith.constant 0 : index
    %c0_4 = arith.constant 0 : index
    %2 = vector.load %arg4[%c0_3, %c0_4] : memref<128x65xf32, #tpu.memory_space<vmem>>, vector<128x65xf32>
    %c0_5 = arith.constant 0 : index
    %c0_6 = arith.constant 0 : index
    %c0_7 = arith.constant 0 : index
    %3 = vector.load %arg5[%c0_5, %c0_6, %c0_7] : memref<8x128x65xbf16, #tpu.memory_space<vmem>>, vector<8x128x65xbf16>
    %4 = arith.extf %3 : vector<8x128x65xbf16> to vector<8x128x65xf32>
    %cst = arith.constant dense<0.000000e+00> : vector<8x128xf32>
    %5 = tpu.matmul %0, %1, %cst {dimension_numbers = #tpu.dot_dimension_numbers<[1], [1], [0], [0], [0, 0, 1, 0], [], []>} : vector<8x65xf32>, vector<128x65xf32>, vector<8x128xf32> -> vector<8x128xf32>
    %6 = vector.shape_cast %0 : vector<8x65xf32> to vector<8x1x65xf32>
    %7 = vector.shape_cast %2 : vector<128x65xf32> to vector<1x128x65xf32>
    %8 = vector.broadcast %6 : vector<8x1x65xf32> to vector<8x128x65xf32>
    %9 = vector.broadcast %7 : vector<1x128x65xf32> to vector<8x128x65xf32>
    %10 = arith.mulf %8, %9 : vector<8x128x65xf32>
    %11 = arith.mulf %10, %4 : vector<8x128x65xf32>
    %cst_8 = arith.constant dense<0.000000e+00> : vector<8x128xf32>
    %12 = vector.multi_reduction <add>, %11, %cst_8 [2] : vector<8x128x65xf32> to vector<8x128xf32>
    %13 = arith.addf %5, %12 : vector<8x128xf32>
    %c0_9 = arith.constant 0 : index
    %c0_10 = arith.constant 0 : index
    %14 = vector.load %arg6[%c0_9, %c0_10] : memref<8x128xf32, #tpu.memory_space<vmem>>, vector<8x128xf32>
    tpu.vector_store %arg6[%c0_9, %c0_10], %13 {strides = array<i32>} : memref<8x128xf32, #tpu.memory_space<vmem>>, vector<8x128xf32>,
    return
  }
  func.func @transform_0(%arg0: i32, %arg1: i32) -> (i32, i32) {
    %c0_i32 = arith.constant 0 : i32
    %c0_i32_0 = arith.constant 0 : i32
    return %arg0, %c0_i32 : i32, i32
  }
  func.func @transform_1(%arg0: i32, %arg1: i32) -> (i32, i32) {
    %c0_i32 = arith.constant 0 : i32
    %c0_i32_0 = arith.constant 0 : i32
    return %arg1, %c0_i32 : i32, i32
  }
  func.func @transform_2(%arg0: i32, %arg1: i32) -> (i32, i32) {
    %c0_i32 = arith.constant 0 : i32
    %c0_i32_0 = arith.constant 0 : i32
    return %arg1, %c0_i32 : i32, i32
  }
  func.func @transform_3(%arg0: i32, %arg1: i32) -> (i32, i32, i32) {
    %c0_i32 = arith.constant 0 : i32
    %c0_i32_0 = arith.constant 0 : i32
    return %arg0, %arg1, %c0_i32 : i32, i32, i32
  }
  func.func @transform_4(%arg0: i32, %arg1: i32) -> (i32, i32) {
    %c0_i32 = arith.constant 0 : i32
    return %arg0, %arg1 : i32, i32
  }
}

</mosaic_0001>

<bundles_post_ra>
// kernel: tpu_custom_call.1
= control target key start
LH: loop header
LB: loop body
LE: loop exit
PB: predicated region body
PF: predicated region fallthrough
CT: control target
= control target key end

     0   :  { %9 = vsyncpa [#allocation4], 0  ;;  %s4980_s0 = inlined_call_operand.vmem [shape: f32[16,65], index: 0, kind: input, shape index: {}]   ;;  %s4981_s1 = inlined_call_operand.vmem [shape: f32[256,65], index: 1, kind: input, shape index: {}]   ;;  %s4982_s2 = inlined_call_operand.vmem [shape: f32[256,65], index: 2, kind: input, shape index: {}]   ;;  %s4983_s3 = inlined_call_operand.vmem [shape: bf16[16,256,65], index: 3, kind: input, shape index: {}]   ;;  %s4984_s4 = inlined_call_operand.hbm [shape: f32[16,256], index: 4, kind: output, shape index: {}]  }
   0x1   :  { %11 = vsyncpa [#allocation4 + $0x1], 0  ;;  %s3570_s15 = smov 0   ;;  %s3572_s16 = smov 0  }
   0x2   :  { %s3574_s17 = smov 0   ;;  %s3576_s18 = smov 0  }
   0x3   :  { %s3578_s19 = smov 0   ;;  %s3580_s20 = smov 0  }
   0x4   :  { %s3582_s21 = smov 0   ;;  %s3584_s22 = smov 0  }
   0x5 LB: > { %s2909_s23 = sadd.s32 4294967295, %s3538_s22   ;;  %s2910_s24 = sadd.s32 4294967294, %s3538_s22   ;;  %s3538_s22 = sphi %s3584_s22, %s17_s22   ;;  %s3534_s21 = sphi %s3582_s21, %s5002_s21   ;;  %s3530_s20 = sphi %s3580_s20, %s5001_s20   ;;  %s3526_s19 = sphi %s3578_s19, %s5000_s19   ;;  %s3522_s18 = sphi %s3576_s18, %s4999_s18   ;;  %s3518_s17 = sphi %s3574_s17, %s4998_s17   ;;  %s3514_s16 = sphi %s3572_s16, %s4997_s16   ;;  %s3510_s15 = sphi %s3570_s15, %s4996_s15  }
   0x6   : > { %s26_s25 = sadd.s32 1, %s3530_s20  ;;  %s29_s26 = sadd.s32 1, %s3534_s21 }
   0x7   : > { %p27_p0 = scmp.ge.s32.totalorder %s26_s25, 2  ;;  %p123_p1 = scmp.ne.s32.totalorder %s3518_s17, %s3514_s16 }
   0x8   : > { %p124_p2 = scmp.eq.s32.totalorder %s3538_s22, 0  ;;  %p155_p5 = scmp.eq.s32.totalorder %s2909_s23, 3 }
   0x9   : > { %s5004_s25 = smov (%p27_p0, %s26_s25), 0  ;;  %s5006_s26 = smov (!%p27_p0, %s29_s26), %s3534_s21 }
   0xa   : > { %s112_s27 = ssub.s32 %s3530_s20, %s5004_s25  ;;  %p3622_p3 = por %p124_p2, %p123_p1 }
   0xb   : > { %p31_p4 = scmp.ge.s32.totalorder %s5006_s26, 2  ;;  %p160_p6 = scmp.ne.s32.totalorder %s3514_s16, %s3510_s15 }
   0xc   : > { %p161_p7 = scmp.eq.s32.totalorder %s2910_s24, 3  ;;  %p3630_p8 = por %p155_p5, %p123_p1 }
   0xd   : > { %s5008_s26 = smov (%p31_p4, %s5006_s26), 0  ;;  %s116_s7 = sadd.s32 1, %s3518_s17 }
   0xe   : > { %p3634_p9 = por %p161_p7, %p160_p6  ;;  %s111_s5 = ssub.s32 %s3534_s21, %s5008_s26 }
   0xf   : > { %s113_s6 = sor.u32 %s112_s27, %s111_s5  ;;  %p2912_p11 = scmp.ge.s32.totalorder %s3538_s22, 4 }
  0x10   : > { %p114_p10 = scmp.eq.s32.totalorder %s113_s6, 0 }
  0x11   : > { %177 = sbr.rel (%p2912_p11) target bundleno = 63 (0x3f), region = 16 }
  0x12   : > { %s3642_s8 = scalar_select %p114_p10, %s3518_s17, %s116_s7  }
  0x18   : > { %205 = sbr.rel (!%p3622_p3) target bundleno = 63 (0x3f), region = 32  ;;  %s207_s9 = sand.u32 (%p3622_p3), 1, %s3518_s17  }
  0x19   : > { %s2915_s10 = sshll.u32 (%p3622_p3), %s3530_s20, 4  ;;  %s2913_s11 = sshll.u32 (%p3622_p3), %s207_s9, 9 }
  0x1a   : > { %s2948_s12 = sshll.u32 (%p3622_p3), %s3534_s21, 8  ;;  %s3658_s28 = scalar_lea.vmem (%p3622_p3), [#allocation2], %s2913_s11 }
  0x1b   : > { %s213_s13 = sadd.s32 (%p3622_p3), %s2948_s12, %s2915_s10 }
  0x1c   : > { %s2917_s14 = sshll.u32 (%p3622_p3), %s213_s13, 2 }
  0x1d   : > { %s3653_s27 = scalar_lea.vmem (%p3622_p3), %s4983_s3, %s2917_s14 }
  0x1e   : > { %v231_v0 = vld [vmem:[%s3653_s27] sm:$0xff] (%p3622_p3)   ;;  %v235_v1 = vld [vmem:[%s3653_s27 + $0x8] sm:$0xff] (%p3622_p3)   ;;  %v239_v2 = vld [vmem:[%s3653_s27 + $0x10] sm:$0xff] (%p3622_p3)  }
  0x1f   : > { %232 = vst [vmem:[%s3658_s28] sm:$0xff] %v231_v0   ;;  %236 = vst [vmem:[%s3658_s28 + $0x8] sm:$0xff] %v235_v1   ;;  %v243_v3 = vld [vmem:[%s3653_s27 + $0x18] sm:$0xff]   ;;  %v247_v4 = vld [vmem:[%s3653_s27 + $0x20] sm:$0xff]  }
  0x20   : > { %240 = vst [vmem:[%s3658_s28 + $0x10] sm:$0xff] %v239_v2   ;;  %v251_v5 = vld [vmem:[%s3653_s27 + $0x28] sm:$0xff]   ;;  %244 = vst [vmem:[%s3658_s28 + $0x18] sm:$0xff] %v243_v3   ;;  %v255_v6 = vld [vmem:[%s3653_s27 + $0x30] sm:$0xff]  }
  0x21   : > { %248 = vst [vmem:[%s3658_s28 + $0x20] sm:$0xff] %v247_v4   ;;  %252 = vst [vmem:[%s3658_s28 + $0x28] sm:$0xff] %v251_v5   ;;  %v259_v7 = vld [vmem:[%s3653_s27 + $0x38] sm:$0xff]   ;;  %v263_v8 = vld [vmem:[%s3653_s27 + $0x80] sm:$0xff]  }
  0x22   : > { %256 = vst [vmem:[%s3658_s28 + $0x30] sm:$0xff] %v255_v6   ;;  %260 = vst [vmem:[%s3658_s28 + $0x38] sm:$0xff] %v259_v7   ;;  %v267_v9 = vld [vmem:[%s3653_s27 + $0x88] sm:$0xff]   ;;  %v271_v10 = vld [vmem:[%s3653_s27 + $0x90] sm:$0xff]  }
  0x23   : > { %264 = vst [vmem:[%s3658_s28 + $0x40] sm:$0xff] %v263_v8   ;;  %v275_v11 = vld [vmem:[%s3653_s27 + $0x98] sm:$0xff]   ;;  %268 = vst [vmem:[%s3658_s28 + $0x48] sm:$0xff] %v267_v9   ;;  %v279_v12 = vld [vmem:[%s3653_s27 + $0xa0] sm:$0xff]  }
  0x24   : > { %272 = vst [vmem:[%s3658_s28 + $0x50] sm:$0xff] %v271_v10   ;;  %276 = vst [vmem:[%s3658_s28 + $0x58] sm:$0xff] %v275_v11   ;;  %v283_v13 = vld [vmem:[%s3653_s27 + $0xa8] sm:$0xff]   ;;  %v287_v14 = vld [vmem:[%s3653_s27 + $0xb0] sm:$0xff]  }
  0x25   : > { %280 = vst [vmem:[%s3658_s28 + $0x60] sm:$0xff] %v279_v12   ;;  %284 = vst [vmem:[%s3658_s28 + $0x68] sm:$0xff] %v283_v13   ;;  %v291_v15 = vld [vmem:[%s3653_s27 + $0xb8] sm:$0xff]   ;;  %v295_v16 = vld [vmem:[%s3653_s27 + $0x100] sm:$0xff]  }
  0x26   : > { %288 = vst [vmem:[%s3658_s28 + $0x70] sm:$0xff] %v287_v14   ;;  %v299_v17 = vld [vmem:[%s3653_s27 + $0x108] sm:$0xff]   ;;  %292 = vst [vmem:[%s3658_s28 + $0x78] sm:$0xff] %v291_v15   ;;  %v303_v18 = vld [vmem:[%s3653_s27 + $0x110] sm:$0xff]  }
  0x27   : > { %296 = vst [vmem:[%s3658_s28 + $0x80] sm:$0xff] %v295_v16   ;;  %300 = vst [vmem:[%s3658_s28 + $0x88] sm:$0xff] %v299_v17   ;;  %v307_v19 = vld [vmem:[%s3653_s27 + $0x118] sm:$0xff]   ;;  %v311_v20 = vld [vmem:[%s3653_s27 + $0x120] sm:$0xff]  }
  0x28   : > { %304 = vst [vmem:[%s3658_s28 + $0x90] sm:$0xff] %v303_v18   ;;  %308 = vst [vmem:[%s3658_s28 + $0x98] sm:$0xff] %v307_v19   ;;  %v315_v21 = vld [vmem:[%s3653_s27 + $0x128] sm:$0xff]   ;;  %v319_v22 = vld [vmem:[%s3653_s27 + $0x130] sm:$0xff]  }
  0x29   : > { %312 = vst [vmem:[%s3658_s28 + $0xa0] sm:$0xff] %v311_v20   ;;  %v323_v23 = vld [vmem:[%s3653_s27 + $0x138] sm:$0xff]   ;;  %316 = vst [vmem:[%s3658_s28 + $0xa8] sm:$0xff] %v315_v21   ;;  %v327_v24 = vld [vmem:[%s3653_s27 + $0x180] sm:$0xff]  }
  0x2a   : > { %320 = vst [vmem:[%s3658_s28 + $0xb0] sm:$0xff] %v319_v22   ;;  %324 = vst [vmem:[%s3658_s28 + $0xb8] sm:$0xff] %v323_v23   ;;  %v331_v25 = vld [vmem:[%s3653_s27 + $0x188] sm:$0xff]   ;;  %v335_v26 = vld [vmem:[%s3653_s27 + $0x190] sm:$0xff]  }
  0x2b   : > { %328 = vst [vmem:[%s3658_s28 + $0xc0] sm:$0xff] %v327_v24   ;;  %332 = vst [vmem:[%s3658_s28 + $0xc8] sm:$0xff] %v331_v25   ;;  %v339_v27 = vld [vmem:[%s3653_s27 + $0x198] sm:$0xff]   ;;  %v343_v28 = vld [vmem:[%s3653_s27 + $0x1a0] sm:$0xff]  }
  0x2c   : > { %336 = vst [vmem:[%s3658_s28 + $0xd0] sm:$0xff] %v335_v26   ;;  %v347_v29 = vld [vmem:[%s3653_s27 + $0x1a8] sm:$0xff]   ;;  %340 = vst [vmem:[%s3658_s28 + $0xd8] sm:$0xff] %v339_v27   ;;  %v351_v30 = vld [vmem:[%s3653_s27 + $0x1b0] sm:$0xff]  }
  0x2d   : > { %344 = vst [vmem:[%s3658_s28 + $0xe0] sm:$0xff] %v343_v28   ;;  %348 = vst [vmem:[%s3658_s28 + $0xe8] sm:$0xff] %v347_v29   ;;  %v355_v31 = vld [vmem:[%s3653_s27 + $0x1b8] sm:$0xff]   ;;  %v359_v32 = vld [vmem:[%s3653_s27 + $0x200] sm:$0xff]  }
  0x2e   : > { %352 = vst [vmem:[%s3658_s28 + $0xf0] sm:$0xff] %v351_v30   ;;  %356 = vst [vmem:[%s3658_s28 + $0xf8] sm:$0xff] %v355_v31   ;;  %v363_v33 = vld [vmem:[%s3653_s27 + $0x208] sm:$0xff]   ;;  %v367_v34 = vld [vmem:[%s3653_s27 + $0x210] sm:$0xff]  }
  0x2f   : > { %360 = vst [vmem:[%s3658_s28 + $0x100] sm:$0xff] %v359_v32   ;;  %v371_v35 = vld [vmem:[%s3653_s27 + $0x218] sm:$0xff]   ;;  %364 = vst [vmem:[%s3658_s28 + $0x108] sm:$0xff] %v363_v33   ;;  %v375_v36 = vld [vmem:[%s3653_s27 + $0x220] sm:$0xff]  }
  0x30   : > { %368 = vst [vmem:[%s3658_s28 + $0x110] sm:$0xff] %v367_v34   ;;  %372 = vst [vmem:[%s3658_s28 + $0x118] sm:$0xff] %v371_v35   ;;  %v379_v37 = vld [vmem:[%s3653_s27 + $0x228] sm:$0xff]   ;;  %v383_v38 = vld [vmem:[%s3653_s27 + $0x230] sm:$0xff]  }
  0x31   : > { %376 = vst [vmem:[%s3658_s28 + $0x120] sm:$0xff] %v375_v36   ;;  %380 = vst [vmem:[%s3658_s28 + $0x128] sm:$0xff] %v379_v37   ;;  %v387_v39 = vld [vmem:[%s3653_s27 + $0x238] sm:$0xff]   ;;  %v391_v40 = vld [vmem:[%s3653_s27 + $0x280] sm:$0xff]  }
  0x32   : > { %384 = vst [vmem:[%s3658_s28 + $0x130] sm:$0xff] %v383_v38   ;;  %v395_v41 = vld [vmem:[%s3653_s27 + $0x288] sm:$0xff]   ;;  %388 = vst [vmem:[%s3658_s28 + $0x138] sm:$0xff] %v387_v39   ;;  %v399_v42 = vld [vmem:[%s3653_s27 + $0x290] sm:$0xff]  }
  0x33   : > { %392 = vst [vmem:[%s3658_s28 + $0x140] sm:$0xff] %v391_v40   ;;  %396 = vst [vmem:[%s3658_s28 + $0x148] sm:$0xff] %v395_v41   ;;  %v403_v43 = vld [vmem:[%s3653_s27 + $0x298] sm:$0xff]   ;;  %v407_v44 = vld [vmem:[%s3653_s27 + $0x2a0] sm:$0xff]  }
  0x34   : > { %400 = vst [vmem:[%s3658_s28 + $0x150] sm:$0xff] %v399_v42   ;;  %404 = vst [vmem:[%s3658_s28 + $0x158] sm:$0xff] %v403_v43   ;;  %v411_v45 = vld [vmem:[%s3653_s27 + $0x2a8] sm:$0xff]   ;;  %v415_v46 = vld [vmem:[%s3653_s27 + $0x2b0] sm:$0xff]  }
  0x35   : > { %408 = vst [vmem:[%s3658_s28 + $0x160] sm:$0xff] %v407_v44   ;;  %v419_v47 = vld [vmem:[%s3653_s27 + $0x2b8] sm:$0xff]   ;;  %412 = vst [vmem:[%s3658_s28 + $0x168] sm:$0xff] %v411_v45   ;;  %v423_v48 = vld [vmem:[%s3653_s27 + $0x300] sm:$0xff]  }
  0x36   : > { %416 = vst [vmem:[%s3658_s28 + $0x170] sm:$0xff] %v415_v46   ;;  %420 = vst [vmem:[%s3658_s28 + $0x178] sm:$0xff] %v419_v47   ;;  %v427_v49 = vld [vmem:[%s3653_s27 + $0x308] sm:$0xff]   ;;  %v431_v50 = vld [vmem:[%s3653_s27 + $0x310] sm:$0xff]  }
  0x37   : > { %424 = vst [vmem:[%s3658_s28 + $0x180] sm:$0xff] %v423_v48   ;;  %428 = vst [vmem:[%s3658_s28 + $0x188] sm:$0xff] %v427_v49   ;;  %v435_v51 = vld [vmem:[%s3653_s27 + $0x318] sm:$0xff]   ;;  %v439_v52 = vld [vmem:[%s3653_s27 + $0x320] sm:$0xff]  }
  0x38   : > { %432 = vst [vmem:[%s3658_s28 + $0x190] sm:$0xff] %v431_v50   ;;  %v443_v53 = vld [vmem:[%s3653_s27 + $0x328] sm:$0xff]   ;;  %436 = vst [vmem:[%s3658_s28 + $0x198] sm:$0xff] %v435_v51   ;;  %v447_v54 = vld [vmem:[%s3653_s27 + $0x330] sm:$0xff]  }
  0x39   : > { %440 = vst [vmem:[%s3658_s28 + $0x1a0] sm:$0xff] %v439_v52   ;;  %444 = vst [vmem:[%s3658_s28 + $0x1a8] sm:$0xff] %v443_v53   ;;  %v451_v55 = vld [vmem:[%s3653_s27 + $0x338] sm:$0xff]   ;;  %v455_v56 = vld [vmem:[%s3653_s27 + $0x380] sm:$0xff]  }
  0x3a   : > { %448 = vst [vmem:[%s3658_s28 + $0x1b0] sm:$0xff] %v447_v54   ;;  %452 = vst [vmem:[%s3658_s28 + $0x1b8] sm:$0xff] %v451_v55   ;;  %v459_v57 = vld [vmem:[%s3653_s27 + $0x388] sm:$0xff]   ;;  %v463_v58 = vld [vmem:[%s3653_s27 + $0x390] sm:$0xff]  }
  0x3b   : > { %456 = vst [vmem:[%s3658_s28 + $0x1c0] sm:$0xff] %v455_v56   ;;  %v467_v59 = vld [vmem:[%s3653_s27 + $0x398] sm:$0xff]   ;;  %460 = vst [vmem:[%s3658_s28 + $0x1c8] sm:$0xff] %v459_v57   ;;  %v471_v60 = vld [vmem:[%s3653_s27 + $0x3a0] sm:$0xff]  }
  0x3c   : > { %464 = vst [vmem:[%s3658_s28 + $0x1d0] sm:$0xff] %v463_v58   ;;  %468 = vst [vmem:[%s3658_s28 + $0x1d8] sm:$0xff] %v467_v59   ;;  %v475_v61 = vld [vmem:[%s3653_s27 + $0x3a8] sm:$0xff]   ;;  %v479_v62 = vld [vmem:[%s3653_s27 + $0x3b0] sm:$0xff]  }
  0x3d   : > { %472 = vst [vmem:[%s3658_s28 + $0x1e0] sm:$0xff] %v471_v60   ;;  %476 = vst [vmem:[%s3658_s28 + $0x1e8] sm:$0xff] %v475_v61   ;;  %v483_v63 = vld [vmem:[%s3653_s27 + $0x3b8] sm:$0xff]  }
  0x3e   : > { %480 = vst [vmem:[%s3658_s28 + $0x1f0] sm:$0xff] %v479_v62   ;;  %484 = vst [vmem:[%s3658_s28 + $0x1f8] sm:$0xff] %v483_v63  }
  0x3f PF: > { %p2918_p12 = scmp.ge.s32.totalorder %s3538_s22, 1  ;;  %p764_p13 = scmp.lt.s32.totalorder %s3538_s22, 5 }
  0x41   : > { %p765_p0 = pnand %p2918_p12, %p764_p13 }
  0x42   : > { %s3788_s5 = sand.u32 (!%p765_p0), 1, %s3514_s16   ;;  %p810_p1 = scmp.lt.s32.totalorder (!%p765_p0), %s3526_s19, 1  ;;  %v1122_v0 = vlaneseq (!%p765_p0)  ;;  %v3540_v1 = vmov (!%p765_p0), 1966171168   ;;  %vm1463_vm0 = vcmask (!%p765_p0), 531456   ;;  %v3541_v28 = vmov (!%p765_p0), 0.0|0.0  }
  0x43   : > { %768 = sbr.rel (%p765_p0) target bundleno = 505 (0x1f9), region = 73  ;;  %s2922_s6 = sshll.u32 (!%p765_p0), %s3522_s18, 4  ;;  %v1120_v2 = vunpack.c.l.s4 (!%p765_p0), %v3540_v1  ;;  %3320 = vmatprep.subr.bf16.mxu0 (!%p765_p0), %v3541_v28  ;;  %vm4010_vm1 = vmpackc.low (!%p765_p0), %vm1463_vm0, %vm1463_vm0  ;;  %vm3542_vm2 = vmmov (!%p765_p0), 0   ;;  %vm1987_vm3 = vcmask (!%p765_p0), 130112   ;;  %vm1994_vm4 = vcmask (!%p765_p0), 195712  }
  0x44   : > { %s2919_s7 = sshll.u32 (!%p765_p0), %s3788_s5, 9  ;;  %p815_p2 = scmp.lt.s32.totalorder (!%p765_p0), %s2922_s6, 31  ;;  %v3794_v3 = vshrl.u32 (!%p765_p0), %v1122_v0, 7  ;;  %vm2001_vm5 = vcmask (!%p765_p0), 261312   ;;  %vm2008_vm6 = vcmask (!%p765_p0), 326912   ;;  %vm2015_vm7 = vcmask (!%p765_p0), 392512  }
  0x45   : > { %v1121_v4 = vunpack.c.0.s8 (!%p765_p0), %v1120_v2  ;;  %s3815_s28 = scalar_lea.vmem (!%p765_p0), [#allocation2], %s2919_s7  ;;  %vm2022_vm8 = vcmask (!%p765_p0), 458112   ;;  %vm2029_vm9 = vcmask (!%p765_p0), 523712   ;;  %vm2036_vm10 = vcmask (!%p765_p0), 589312   ;;  %s2944_s11 = sshll.u32 (!%p765_p0), %s3526_s19, 1 }
  0x46   : > { %v3205_v7 = vld [vmem:[%s3815_s28 + $0x8] sm:$0xff] (!%p765_p0)   ;;  %v3823_v9 = vsub.s32 (!%p765_p0), 0, %v3794_v3  ;;  %v2950_v10 = vld [vmem:[%s3815_s28] sm:$0xff] (!%p765_p0)   ;;  %v3206_v22 = vld [vmem:[%s3815_s28 + $0x10] sm:$0xff] (!%p765_p0)   ;;  %vm2043_vm11 = vcmask (!%p765_p0), 654912   ;;  %vm2050_vm12 = vcmask (!%p765_p0), 720512   ;;  %s2788_s12 = sadd.s32 (!%p765_p0), %s3522_s18, %s2944_s11 }
  0x47   : > { %v3800_v5 = vsub.s32 (!%p765_p0), %v1121_v4, %v3794_v3  ;;  %v2955_v13 = vunpack.c.l.bf16 (!%p765_p0), %v3205_v7  ;;  %v2951_v18 = vunpack.c.l.bf16 (!%p765_p0), %v2950_v10  ;;  %v2956_v19 = vunpack.c.h.bf16 (!%p765_p0), %v3205_v7  ;;  %v3207_v38 = vld [vmem:[%s3815_s28 + $0x18] sm:$0xff] (!%p765_p0)   ;;  %v3208_v50 = vld [vmem:[%s3815_s28 + $0x20] sm:$0xff] (!%p765_p0)   ;;  %v3209_v57 = vld [vmem:[%s3815_s28 + $0x28] sm:$0xff] (!%p765_p0)   ;;  %s3544_s7 = smov (!%p765_p0), [#allocation3]  }
  0x48   : > { %v2952_v20 = vunpack.c.h.bf16 (!%p765_p0), %v2950_v10  ;;  %v2960_v29 = vunpack.c.h.bf16 (!%p765_p0), %v3206_v22  ;;  %v2959_v31 = vunpack.c.l.bf16 (!%p765_p0), %v3206_v22  ;;  %v2964_v42 = vunpack.c.h.bf16 (!%p765_p0), %v3207_v38  ;;  %v3210_v10 = vld [vmem:[%s3815_s28 + $0x30] sm:$0xff] (!%p765_p0)  }
  0x49   : > { %v2963_v44 = vunpack.c.l.bf16 (!%p765_p0), %v3207_v38  ;;  %v2968_v55 = vunpack.c.h.bf16 (!%p765_p0), %v3208_v50  ;;  %v2967_v56 = vunpack.c.l.bf16 (!%p765_p0), %v3208_v50  ;;  %v2972_v1 = vunpack.c.h.bf16 (!%p765_p0), %v3209_v57 }
  0x4a   : > { %s811_s9 = scalar_select %p810_p1, %s3526_s19, 1  ;;  %v2971_v7 = vunpack.c.l.bf16 %v3209_v57  ;;  %vm2057_vm13 = vcmask 786112   ;;  %vm4985_vm14 = vcmask 851712   ;;  %vm2071_vm15 = vcmask 917312  }
  0x4b   : > { %s5010_s6 = smov (!%p815_p2, %s2922_s6), 31  ;;  %s2945_s19 = sshll.u32 %s2788_s12, 7 }
  0x4c   : > { %s2921_s10 = sshll.u32 %s811_s9, 3  ;;  %s2923_s14 = sshll.u32 %s5010_s6, 3 }
  0x4d   : > { %s813_s13 = scalar_lea.vmem %s4980_s0, %s2921_s10  ;;  %s3811_s27 = scalar_lea.vmem %s4982_s2, %s2923_s14 }
  0x4e   : > { %v3813_v6 = vld [vmem:[%s813_s13] sm:$0xff]  ;;  %v3827_v11 = vld [vmem:[%s3811_s27 + $0x10] sm:$0xff]  ;;  %v3837_v15 = vld [vmem:[%s3811_s27 + $0x18] sm:$0xff]  ;;  %s3992_s10 = scalar_lea.vmem %s4981_s1, %s2923_s14  ;;  %s2920_s6 = sshll.u32 %s3788_s5, 3 }
  0x4f   : > { %v3820_v8 = vrot.slane %v3813_v6, %v3800_v5  ;;  %v3834_v14 = vld [vmem:[%s3811_s27] sm:$0xff]  ;;  %v3840_v16 = vld [vmem:[%s3811_s27 + $0x8] sm:$0xff]  ;;  %v3867_v37 = vld [vmem:[%s3811_s27 + $0x38] sm:$0xff]  ;;  %s809_s13 = scalar_lea.vmem [#allocation3], %s2920_s6  ;;  %s4926_s24 = scalar_lea.hbm %s4984_s4, %s2945_s19 }
  0x50   : > { %v3847_v21 = vld [vmem:[%s3811_s27 + $0x28] sm:$0xff]  ;;  %v3851_v23 = vld [vmem:[%s3811_s27 + $0x20] sm:$0xff]  ;;  %v3871_v39 = vld [vmem:[%s3811_s27 + $0x30] sm:$0xff]  ;;  %s2792_s14 = sshll.u32 %s809_s13, 4  ;;  %s3448_s9 = sshll.u32 %s3544_s7, 4  ;;  %s4928_s14 = int_to_ptr.vmem [resolvable:$true] %s2792_s14  ;;  %s3449_s9 = int_to_ptr.vmem [resolvable:$false] %s3448_s9 }
  0x51   : > { %v3831_v12 = vrot.slane %v3820_v8, %v3800_v5  ;;  %v3883_v51 = vld [vmem:[%s3811_s27 + $0x48] sm:$0xff]  ;;  %v3886_v52 = vld [vmem:[%s3811_s27 + $0x40] sm:$0xff]  ;;  %v3896_v62 = vld [vmem:[%s3811_s27 + $0x58] sm:$0xff]  ;;  %p3451_p6 = scmp.lt.s32.totalorder %s4928_s14, %s3449_s9 }
  0x52   : > { %v3899_v63 = vld [vmem:[%s3811_s27 + $0x50] sm:$0xff] }
  0x53   : > { %v3844_v17 = vrot.slane %v3831_v12, %v3823_v9  ;;  %v3930_v38 = vld [vmem:[%s3811_s27 + $0x70] sm:$0xff] }
  0x55   : > { %v1209_v24 = vmul.f32 %v3844_v17, %v3827_v11  ;;  %v1207_v25 = vmul.f32 %v3844_v17, %v3834_v14  ;;  %v1210_v26 = vmul.f32 %v3844_v17, %v3837_v15  ;;  %v1208_v27 = vmul.f32 %v3844_v17, %v3840_v16 }
  0x56   : > { %v1212_v30 = vmul.f32 %v3844_v17, %v3847_v21  ;;  %v1211_v32 = vmul.f32 %v3844_v17, %v3851_v23  ;;  %v1214_v43 = vmul.f32 %v3844_v17, %v3867_v37  ;;  %v1213_v45 = vmul.f32 %v3844_v17, %v3871_v39 }
  0x57   : > { %v1337_v33 = vmul.f32 %v2955_v13, %v1209_v24  ;;  %v1335_v34 = vmul.f32 %v2951_v18, %v1207_v25  ;;  %v1338_v35 = vmul.f32 %v2956_v19, %v1210_v26  ;;  %v1336_v36 = vmul.f32 %v2952_v20, %v1208_v27  ;;  %v3911_v24 = vld [vmem:[%s3811_s27 + $0x68] sm:$0xff]  ;;  %v3914_v25 = vld [vmem:[%s3811_s27 + $0x60] sm:$0xff] }
  0x58   : > { %v1340_v48 = vmul.f32 %v2960_v29, %v1212_v30  ;;  %v1339_v49 = vmul.f32 %v2959_v31, %v1211_v32  ;;  %v1342_v53 = vmul.f32 %v2964_v42, %v1214_v43  ;;  %v1341_v54 = vmul.f32 %v2963_v44, %v1213_v45  ;;  %v3211_v30 = vld [vmem:[%s3815_s28 + $0x38] sm:$0xff]  }
  0x59   : > { %v1470_v40 = vsel %vm1463_vm0, %v1337_v33, 0.0  ;;  %v1464_v41 = vsel %vm1463_vm0, %v1335_v34, 0.0  ;;  %v1473_v46 = vsel %vm1463_vm0, %v1338_v35, 0.0  ;;  %v1467_v47 = vsel %vm1463_vm0, %v1336_v36, 0.0  ;;  %v3927_v36 = vld [vmem:[%s3811_s27 + $0x78] sm:$0xff] }
  0x5a   : > { %1471 = vadd.xlane.f32.xlu1 %v1470_v40  ;;  %1465 = vadd.xlane.f32.xlu0 %v1464_v41  ;;  %v1479_v58 = vsel %vm1463_vm0, %v1340_v48, 0.0  ;;  %v1476_v59 = vsel %vm1463_vm0, %v1339_v49, 0.0  ;;  %v1216_v60 = vmul.f32 %v3844_v17, %v3883_v51  ;;  %v1215_v61 = vmul.f32 %v3844_v17, %v3886_v52  ;;  %v3212_v48 = vld [vmem:[%s3815_s28 + $0x40] sm:$0xff]  }
  0x5b   : > { %v1485_v2 = vsel %vm1463_vm0, %v1342_v53, 0.0  ;;  %v1482_v4 = vsel %vm1463_vm0, %v1341_v54, 0.0  ;;  %v1133_v13 = vcombine.high %v3820_v8, %v3820_v8  ;;  %v1218_v20 = vmul.f32 %v3844_v17, %v3896_v62 }
  0x5c   : > { %v1344_v18 = vmul.f32 %v2968_v55, %v1216_v60  ;;  %v1343_v19 = vmul.f32 %v2967_v56, %v1215_v61  ;;  %v1217_v22 = vmul.f32 %v3844_v17, %v3899_v63  ;;  %v2976_v26 = vunpack.c.h.bf16 %v3210_v10 }
  0x5d   : > { %v1220_v8 = vmul.f32 %v3844_v17, %v3911_v24  ;;  %v2975_v27 = vunpack.c.l.bf16 %v3210_v10  ;;  %v1219_v29 = vmul.f32 %v3844_v17, %v3914_v25  ;;  %v3922_v31 = vrot.slane %v1133_v13, %v3800_v5 }
  0x5e   : > { %1474 = vadd.xlane.f32.xlu1 %v1473_v46  ;;  %1468 = vadd.xlane.f32.xlu0 %v1467_v47  ;;  %v1491_v32 = vsel %vm1463_vm0, %v1344_v18, 0.0  ;;  %v1488_v33 = vsel %vm1463_vm0, %v1343_v19, 0.0  ;;  %v1346_v34 = vmul.f32 %v2972_v1, %v1218_v20  ;;  %v1345_v35 = vmul.f32 %v2971_v7, %v1217_v22  ;;  %v3214_v18 = vld [vmem:[%s3815_s28 + $0x50] sm:$0xff]  }
  0x5f   : > { %v2980_v40 = vunpack.c.h.bf16 %v3211_v30  ;;  %v1348_v41 = vmul.f32 %v2976_v26, %v1220_v8  ;;  %v1222_v42 = vmul.f32 %v3844_v17, %v3927_v36  ;;  %v2979_v43 = vunpack.c.l.bf16 %v3211_v30 }
  0x60   : > { %v1221_v44 = vmul.f32 %v3844_v17, %v3930_v38  ;;  %v1497_v45 = vsel %vm1463_vm0, %v1346_v34, 0.0  ;;  %v1494_v46 = vsel %vm1463_vm0, %v1345_v35, 0.0  ;;  %v1347_v47 = vmul.f32 %v2975_v27, %v1219_v29 }
  0x61   : > { %v3941_v49 = vrot.slane %v3922_v31, %v3823_v9  ;;  %v1350_v50 = vmul.f32 %v2980_v40, %v1222_v42  ;;  %v2984_v54 = vunpack.c.h.bf16 %v3212_v48  ;;  %v2983_v55 = vunpack.c.l.bf16 %v3212_v48 }
  0x62   : > { %1480 = vadd.xlane.f32.xlu1 %v1479_v58  ;;  %1477 = vadd.xlane.f32.xlu0 %v1476_v59  ;;  %v1349_v53 = vmul.f32 %v2979_v43, %v1221_v44  ;;  %v1503_v17 = vsel %vm1463_vm0, %v1348_v41, 0.0  ;;  %v1500_v56 = vsel %vm1463_vm0, %v1347_v47, 0.0  ;;  %v3213_v59 = vld [vmem:[%s3815_s28 + $0x48] sm:$0xff]   ;;  %v2992_v19 = vunpack.c.h.bf16 %v3214_v18 }
  0x63   : > { %v1224_v57 = vmul.f32 %v3941_v49, %v3840_v16  ;;  %v1223_v58 = vmul.f32 %v3941_v49, %v3834_v14  ;;  %v1509_v60 = vsel %vm1463_vm0, %v1350_v50, 0.0  ;;  %v2988_v1 = vunpack.c.h.bf16 %v3213_v59 }
  0x64   : > { %v1506_v61 = vsel %vm1463_vm0, %v1349_v53, 0.0  ;;  %v1226_v10 = vmul.f32 %v3941_v49, %v3837_v15  ;;  %v1225_v13 = vmul.f32 %v3941_v49, %v3827_v11  ;;  %v1228_v20 = vmul.f32 %v3941_v49, %v3847_v21 }
  0x65   : > { %v1351_v7 = vmul.f32 %v2983_v55, %v1223_v58  ;;  %v2991_v22 = vunpack.c.l.bf16 %v3214_v18  ;;  %v1227_v26 = vmul.f32 %v3941_v49, %v3851_v23  ;;  %v1230_v35 = vmul.f32 %v3941_v49, %v3867_v37 }
  0x66   : > { %1486 = vadd.xlane.f32.xlu1 %v1485_v2  ;;  %1483 = vadd.xlane.f32.xlu0 %v1482_v4  ;;  %v2987_v2 = vunpack.c.l.bf16 %v3213_v59  ;;  %v1352_v4 = vmul.f32 %v2984_v54, %v1224_v57  ;;  %v1354_v29 = vmul.f32 %v2988_v1, %v1226_v10  ;;  %v1229_v44 = vmul.f32 %v3941_v49, %v3871_v39 }
  0x67   : > { %v1512_v27 = vsel %vm1463_vm0, %v1351_v7, 0.0  ;;  %v1355_v43 = vmul.f32 %v2991_v22, %v1227_v26  ;;  %v1232_v55 = vmul.f32 %v3941_v49, %v3883_v51  ;;  %v1234_v59 = vmul.f32 %v3941_v49, %v3896_v62  ;;  %v3218_v7 = vld [vmem:[%s3815_s28 + $0x70] sm:$0xff]   ;;  %v3219_v22 = vld [vmem:[%s3815_s28 + $0x78] sm:$0xff]  }
  0x68   : > { %v1515_v8 = vsel %vm1463_vm0, %v1352_v4, 0.0  ;;  %v1353_v30 = vmul.f32 %v2987_v2, %v1225_v13  ;;  %v1521_v41 = vsel %vm1463_vm0, %v1354_v29, 0.0  ;;  %v1233_v4 = vmul.f32 %v3941_v49, %v3899_v63  ;;  %v829_v29 = vld [vmem:[%s3992_s10] sm:$0xff] }
  0x69   : > { %v1524_v53 = vsel %vm1463_vm0, %v1355_v43, 0.0  ;;  %v1163_v10 = vcombine.high %v3831_v12, %v3831_v12  ;;  %v3008_v13 = vunpack.c.h.bf16 %v3218_v7  ;;  %v1236_v18 = vmul.f32 %v3941_v49, %v3911_v24 }
  0x6a   : > { %1492 = vadd.xlane.f32.xlu1 %v1491_v32  ;;  %1489 = vadd.xlane.f32.xlu0 %v1488_v33  ;;  %v3215_v32 = vld [vmem:[%s3815_s28 + $0x58] sm:$0xff]   ;;  %v1356_v33 = vmul.f32 %v2992_v19, %v1228_v20  ;;  %v1518_v42 = vsel %vm1463_vm0, %v1353_v30, 0.0  ;;  %v3007_v19 = vunpack.c.l.bf16 %v3218_v7  ;;  %v1235_v20 = vmul.f32 %v3941_v49, %v3914_v25  ;;  %v830_v30 = vld [vmem:[%s3992_s10 + $0x8] sm:$0xff] }
  0x6b   : > { %v2996_v34 = vunpack.c.h.bf16 %v3215_v32  ;;  %v2995_v40 = vunpack.c.l.bf16 %v3215_v32  ;;  %v3012_v32 = vunpack.c.h.bf16 %v3219_v22 }
  0x6d   : > { %v1358_v47 = vmul.f32 %v2996_v34, %v1230_v35  ;;  %v1357_v54 = vmul.f32 %v2995_v40, %v1229_v44  ;;  %v1364_v34 = vmul.f32 %v3008_v13, %v1236_v18  ;;  %v1363_v35 = vmul.f32 %v3007_v19, %v1235_v20  ;;  %v3222_v19 = vld [vmem:[%s3815_s28 + $0x90] sm:$0xff]  }
  0x6e   : > { %1498 = vadd.xlane.f32.xlu1 %v1497_v45  ;;  %1495 = vadd.xlane.f32.xlu0 %v1494_v46  ;;  %v3216_v45 = vld [vmem:[%s3815_s28 + $0x60] sm:$0xff]   ;;  %v1527_v46 = vsel %vm1463_vm0, %v1356_v33, 0.0  ;;  %v4004_v33 = vrot.slane %v1163_v10, %v3823_v9  ;;  %v1238_v40 = vmul.f32 %v3941_v49, %v3927_v36 }
  0x6f   : > { %v3000_v48 = vunpack.c.h.bf16 %v3216_v45  ;;  %v2999_v50 = vunpack.c.l.bf16 %v3216_v45  ;;  %v1533_v57 = vsel %vm1463_vm0, %v1358_v47, 0.0  ;;  %v1237_v45 = vmul.f32 %v3941_v49, %v3930_v38 }
  0x70   : > { %v3321_v47 = vpack.c.bf16 %v830_v30, %v829_v29  ;;  %v1241_v18 = vmul.f32 %v4004_v33, %v3827_v11 }
  0x71   : > { %v1360_v1 = vmul.f32 %v3000_v48, %v1232_v55  ;;  %v1551_v48 = vsel %vm1463_vm0, %v1364_v34, 0.0  ;;  %v831_v55 = vld [vmem:[%s3992_s10 + $0x10] sm:$0xff]  ;;  %v1243_v34 = vmul.f32 %v4004_v33, %v3851_v23 }
  0x72   : > { %1504 = vadd.xlane.f32.xlu1 %v1503_v17  ;;  %1501 = vadd.xlane.f32.xlu0 %v1500_v56  ;;  %v1231_v17 = vmul.f32 %v3941_v49, %v3886_v52  ;;  %v3217_v56 = vld [vmem:[%s3815_s28 + $0x68] sm:$0xff]   ;;  %v1240_v49 = vmul.f32 %v4004_v33, %v3840_v16 }
  0x73   : > { %v3004_v58 = vunpack.c.h.bf16 %v3217_v56  ;;  %v1539_v12 = vsel %vm1463_vm0, %v1360_v1, 0.0  ;;  %3323 = vmatpush3.bf16.xpose.msk.msra.mxu0 %vm4010_vm1, %v3321_v47 }
  0x74   : > { %v1359_v2 = vmul.f32 %v2999_v50, %v1231_v17  ;;  %v1366_v50 = vmul.f32 %v3012_v32, %v1238_v40  ;;  %v832_v17 = vld [vmem:[%s3992_s10 + $0x18] sm:$0xff]  ;;  %3324 = vmatprep.subr.bf16.mxu0 %v3541_v28 }
  0x76   : > { %1510 = vadd.xlane.f32.xlu1 %v1509_v60  ;;  %1507 = vadd.xlane.f32.xlu0 %v1506_v61  ;;  %v3003_v60 = vunpack.c.l.bf16 %v3217_v56  ;;  %v1530_v61 = vsel %vm1463_vm0, %v1357_v54, 0.0  ;;  %v1536_v26 = vsel %vm1463_vm0, %v1359_v2, 0.0  ;;  %v1548_v56 = vsel %vm1463_vm0, %v1363_v35, 0.0  ;;  %v3223_v35 = vld [vmem:[%s3815_s28 + $0x98] sm:$0xff]  }
  0x77   : > { %v1242_v2 = vmul.f32 %v4004_v33, %v3837_v15 }
  0x7a   : > { %1516 = vadd.xlane.f32.xlu1 %v1515_v8  ;;  %1513 = vadd.xlane.f32.xlu0 %v1512_v27  ;;  %v1362_v8 = vmul.f32 %v3004_v58, %v1234_v59  ;;  %v1361_v27 = vmul.f32 %v3003_v60, %v1233_v4  ;;  %v1239_v58 = vmul.f32 %v4004_v33, %v3834_v14  ;;  %v3221_v59 = vld [vmem:[%s3815_s28 + $0x88] sm:$0xff]  }
  0x7b   : > { %v3325_v60 = vpack.c.bf16 %v832_v17, %v831_v55  ;;  %v3020_v1 = vunpack.c.h.bf16 %v3221_v59  ;;  %v3019_v4 = vunpack.c.l.bf16 %v3221_v59  ;;  %v1248_v55 = vmul.f32 %v4004_v33, %v3883_v51 }
  0x7c   : > { %v1545_v43 = vsel %vm1463_vm0, %v1362_v8, 0.0  ;;  %v1542_v44 = vsel %vm1463_vm0, %v1361_v27, 0.0  ;;  %v833_v8 = vld [vmem:[%s3992_s10 + $0x20] sm:$0xff]  ;;  %v834_v27 = vld [vmem:[%s3992_s10 + $0x28] sm:$0xff] }
  0x7d   : > { %3327 = vmatpush3.bf16.xpose.msk.msra.mxu0 %vm4010_vm1, %v3325_v60  ;;  %v1370_v20 = vmul.f32 %v3020_v1, %v1242_v2  ;;  %v1369_v32 = vmul.f32 %v3019_v4, %v1241_v18  ;;  %v3329_v40 = vpack.c.bf16 %v834_v27, %v833_v8  ;;  %v3225_v1 = vld [vmem:[%s3815_s28 + $0xa8] sm:$0xff]   ;;  %v3226_v18 = vld [vmem:[%s3815_s28 + $0xb0] sm:$0xff]   ;;  %v1252_v8 = vmul.f32 %v4004_v33, %v3911_v24 }
  0x7e   : > { %1522 = vadd.xlane.f32.xlu1 %v1521_v41  ;;  %1519 = vadd.xlane.f32.xlu0 %v1518_v42  ;;  %v3011_v41 = vunpack.c.l.bf16 %v3219_v22  ;;  %v3024_v22 = vunpack.c.h.bf16 %v3222_v19 }
  0x7f   : > { %3328 = vmatprep.subr.bf16.mxu0 %v3541_v28 }
  0x82   : > { %1528 = vadd.xlane.f32.xlu1 %v1527_v46  ;;  %1525 = vadd.xlane.f32.xlu0 %v1524_v53  ;;  %v3220_v46 = vld [vmem:[%s3815_s28 + $0x80] sm:$0xff]  }
  0x83   : > { %v3016_v53 = vunpack.c.h.bf16 %v3220_v46  ;;  %v3015_v54 = vunpack.c.l.bf16 %v3220_v46  ;;  %v1566_v46 = vsel %vm1463_vm0, %v1369_v32, 0.0  ;;  %v837_v32 = vld [vmem:[%s3992_s10 + $0x40] sm:$0xff] }
  0x85   : > { %v1368_v10 = vmul.f32 %v3016_v53, %v1240_v49  ;;  %v1367_v13 = vmul.f32 %v3015_v54, %v1239_v58  ;;  %v3224_v53 = vld [vmem:[%s3815_s28 + $0xa0] sm:$0xff]   ;;  %3331 = vmatpush3.bf16.xpose.msk.msra.mxu0 %vm4010_vm1, %v3329_v40  ;;  %v836_v49 = vld [vmem:[%s3992_s10 + $0x38] sm:$0xff]  ;;  %v3039_v40 = vunpack.c.l.bf16 %v3226_v18 }
  0x86   : > { %1534 = vadd.xlane.f32.xlu1 %v1533_v57  ;;  %1531 = vadd.xlane.f32.xlu0 %v1530_v61  ;;  %v1365_v57 = vmul.f32 %v3011_v41, %v1237_v45  ;;  %v1557_v61 = vsel %vm1463_vm0, %v1366_v50, 0.0  ;;  %v1569_v41 = vsel %vm1463_vm0, %v1370_v20, 0.0  ;;  %v1246_v45 = vmul.f32 %v4004_v33, %v3867_v37 }
  0x87   : > { %v1563_v29 = vsel %vm1463_vm0, %v1368_v10, 0.0  ;;  %v1560_v30 = vsel %vm1463_vm0, %v1367_v13, 0.0  ;;  %v1245_v50 = vmul.f32 %v4004_v33, %v3871_v39  ;;  %v3032_v54 = vunpack.c.h.bf16 %v3224_v53  ;;  %3332 = vmatprep.subr.bf16.mxu0 %v3541_v28 }
  0x88   : > { %v1554_v7 = vsel %vm1463_vm0, %v1365_v57, 0.0  ;;  %v3031_v17 = vunpack.c.l.bf16 %v3224_v53  ;;  %v835_v57 = vld [vmem:[%s3992_s10 + $0x30] sm:$0xff]  ;;  %v3036_v10 = vunpack.c.h.bf16 %v3225_v1  ;;  %v1250_v13 = vmul.f32 %v4004_v33, %v3896_v62 }
  0x89   : > { %v3333_v2 = vpack.c.bf16 %v836_v49, %v835_v57  ;;  %v1376_v4 = vmul.f32 %v3032_v54, %v1248_v55  ;;  %v1253_v53 = vmul.f32 %v4004_v33, %v3930_v38 }
  0x8a   : > { %1540 = vadd.xlane.f32.xlu1 %v1539_v12  ;;  %1537 = vadd.xlane.f32.xlu0 %v1536_v26  ;;  %v1244_v12 = vmul.f32 %v4004_v33, %v3847_v21  ;;  %v3023_v26 = vunpack.c.l.bf16 %v3222_v19 }
  0x8b   : > { %v1587_v27 = vsel %vm1463_vm0, %v1376_v4, 0.0 }
  0x8c   : > { %v1371_v47 = vmul.f32 %v3023_v26, %v1243_v34  ;;  %v3040_v26 = vunpack.c.h.bf16 %v3226_v18  ;;  %v838_v34 = vld [vmem:[%s3992_s10 + $0x48] sm:$0xff] }
  0x8d   : > { %3335 = vmatpush3.bf16.xpose.msk.msra.mxu0 %vm4010_vm1, %v3333_v2 }
  0x8e   : > { %1546 = vadd.xlane.f32.xlu1 %v1545_v43  ;;  %1543 = vadd.xlane.f32.xlu0 %v1542_v44  ;;  %v1372_v43 = vmul.f32 %v3024_v22, %v1244_v12  ;;  %v3028_v44 = vunpack.c.h.bf16 %v3223_v35  ;;  %v1572_v59 = vsel %vm1463_vm0, %v1371_v47, 0.0  ;;  %v3035_v22 = vunpack.c.l.bf16 %v3225_v1 }
  0x8f   : > { %v1249_v12 = vmul.f32 %v4004_v33, %v3899_v63  ;;  %3336 = vmatprep.subr.bf16.mxu0 %v3541_v28 }
  0x90   : > { %v1575_v58 = vsel %vm1463_vm0, %v1372_v43, 0.0  ;;  %v1374_v60 = vmul.f32 %v3028_v44, %v1246_v45  ;;  %v3227_v43 = vld [vmem:[%s3815_s28 + $0xb8] sm:$0xff]   ;;  %v1165_v44 = vcombine.high %v3922_v31, %v3922_v31  ;;  %v1380_v45 = vmul.f32 %v3040_v26, %v1252_v8 }
  0x91   : > { %v3044_v47 = vunpack.c.h.bf16 %v3227_v43 }
  0x92   : > { %1552 = vadd.xlane.f32.xlu1 %v1551_v48  ;;  %1549 = vadd.xlane.f32.xlu0 %v1548_v56  ;;  %v3027_v48 = vunpack.c.l.bf16 %v3223_v35  ;;  %v1247_v56 = vmul.f32 %v4004_v33, %v3886_v52  ;;  %v1581_v19 = vsel %vm1463_vm0, %v1374_v60, 0.0  ;;  %v1377_v35 = vmul.f32 %v3035_v22, %v1249_v12  ;;  %v840_v60 = vld [vmem:[%s3992_s10 + $0x58] sm:$0xff] }
  0x93   : > { %v1599_v57 = vsel %vm1463_vm0, %v1380_v45, 0.0 }
  0x94   : > { %v1590_v31 = vsel %vm1463_vm0, %v1377_v35, 0.0  ;;  %v3231_v35 = vld [vmem:[%s3815_s28 + $0xd8] sm:$0xff]  }
  0x96   : > { %1558 = vadd.xlane.f32.xlu1 %v1557_v61  ;;  %1555 = vadd.xlane.f32.xlu0 %v1554_v7  ;;  %v1373_v61 = vmul.f32 %v3027_v48, %v1245_v50  ;;  %v1375_v7 = vmul.f32 %v3031_v17, %v1247_v56  ;;  %v1254_v48 = vmul.f32 %v4004_v33, %v3927_v36  ;;  %v3043_v50 = vunpack.c.l.bf16 %v3227_v43  ;;  %v3228_v17 = vld [vmem:[%s3815_s28 + $0xc0] sm:$0xff]  }
  0x97   : > { %v4098_v56 = vrot.slane %v1165_v44, %v3823_v9  ;;  %v3047_v2 = vunpack.c.l.bf16 %v3228_v17 }
  0x98   : > { %v1578_v20 = vsel %vm1463_vm0, %v1373_v61, 0.0  ;;  %v1382_v49 = vmul.f32 %v3044_v47, %v1254_v48  ;;  %v3060_v47 = vunpack.c.h.bf16 %v3231_v35 }
  0x99   : > { %v1256_v1 = vmul.f32 %v4098_v56, %v3840_v16  ;;  %v1255_v4 = vmul.f32 %v4098_v56, %v3834_v14  ;;  %v1258_v26 = vmul.f32 %v4098_v56, %v3837_v15  ;;  %v1257_v8 = vmul.f32 %v4098_v56, %v3827_v11 }
  0x9a   : > { %1564 = vadd.xlane.f32.xlu1 %v1563_v29  ;;  %1561 = vadd.xlane.f32.xlu0 %v1560_v30  ;;  %v1584_v29 = vsel %vm1463_vm0, %v1375_v7, 0.0  ;;  %v1378_v30 = vmul.f32 %v3036_v10, %v1250_v13  ;;  %v3229_v7 = vld [vmem:[%s3815_s28 + $0xc8] sm:$0xff]   ;;  %v1605_v13 = vsel %vm1463_vm0, %v1382_v49, 0.0  ;;  %v1262_v48 = vmul.f32 %v4098_v56, %v3867_v37  ;;  %v3232_v49 = vld [vmem:[%s3815_s28 + $0xe0] sm:$0xff]  }
  0x9b   : > { %v1383_v12 = vmul.f32 %v3047_v2, %v1255_v4  ;;  %v843_v2 = vld [vmem:[%s3992_s10 + $0x70] sm:$0xff]  ;;  %v844_v4 = vld [vmem:[%s3992_s10 + $0x78] sm:$0xff] }
  0x9c   : > { %v1593_v54 = vsel %vm1463_vm0, %v1378_v30, 0.0  ;;  %v1260_v30 = vmul.f32 %v4098_v56, %v3847_v21 }
  0x9d   : > { %v1608_v44 = vsel %vm1463_vm0, %v1383_v12, 0.0 }
  0x9e   : > { %1570 = vadd.xlane.f32.xlu1 %v1569_v41  ;;  %1567 = vadd.xlane.f32.xlu0 %v1566_v46  ;;  %v1251_v41 = vmul.f32 %v4004_v33, %v3914_v25  ;;  %v3337_v46 = vpack.c.bf16 %v838_v34, %v837_v32  ;;  %v3048_v33 = vunpack.c.h.bf16 %v3228_v17  ;;  %v1259_v34 = vmul.f32 %v4098_v56, %v3851_v23 }
  0xa0   : > { %v1379_v55 = vmul.f32 %v3039_v40, %v1251_v41  ;;  %3339 = vmatpush3.bf16.xpose.msk.msra.mxu0 %vm4010_vm1, %v3337_v46  ;;  %v1384_v22 = vmul.f32 %v3048_v33, %v1256_v1  ;;  %v841_v40 = vld [vmem:[%s3992_s10 + $0x60] sm:$0xff]  ;;  %v842_v41 = vld [vmem:[%s3992_s10 + $0x68] sm:$0xff]  ;;  %v3543_v33 = vmov 0.0   ;;  %v1118_v1 = vcombine.high %v3813_v6, %v3813_v6 }
  0xa1   : > { %3340 = vmatprep.subr.bf16.mxu0 %v3541_v28  ;;  %3317 = vmatprep.mubr.msk.f32.mxu0 %vm3542_vm2, %v3543_v33  ;;  %v3236_v33 = vld [vmem:[%s3815_s28 + $0x100] sm:$0xff]   ;;  %vm2085_vm2 = vcmask 1048512  }
  0xa2   : > { %1576 = vadd.xlane.f32.xlu1 %v1575_v58  ;;  %1573 = vadd.xlane.f32.xlu0 %v1572_v59  ;;  %v1381_v58 = vmul.f32 %v3043_v50, %v1253_v53  ;;  %v839_v59 = vld [vmem:[%s3992_s10 + $0x50] sm:$0xff]  ;;  %v1596_v61 = vsel %vm1463_vm0, %v1379_v55, 0.0  ;;  %v1611_v43 = vsel %vm1463_vm0, %v1384_v22, 0.0  ;;  %v3345_v50 = vpack.c.bf16 %v842_v41, %v841_v40  ;;  %s3450_s10 = scalar_lea.vmem %s3449_s9, 256 }
  0xa3   : > { %v3341_v10 = vpack.c.bf16 %v840_v60, %v839_v59  ;;  %v3349_v22 = vpack.c.bf16 %v844_v4, %v843_v2  ;;  %v1268_v40 = vmul.f32 %v4098_v56, %v3911_v24  ;;  %v3079_v4 = vunpack.c.l.bf16 %v3236_v33 }
  0xa4   : > { %v1602_v18 = vsel %vm1463_vm0, %v1381_v58, 0.0  ;;  %v1390_v58 = vmul.f32 %v3060_v47, %v1262_v48  ;;  %v3235_v48 = vld [vmem:[%s3815_s28 + $0xf8] sm:$0xff]  }
  0xa5   : > { %v3076_v42 = vunpack.c.h.bf16 %v3235_v48 }
  0xa6   : > { %1582 = vadd.xlane.f32.xlu1 %v1581_v19  ;;  %1579 = vadd.xlane.f32.xlu0 %v1578_v20  ;;  %v3052_v19 = vunpack.c.h.bf16 %v3229_v7  ;;  %v3051_v20 = vunpack.c.l.bf16 %v3229_v7 }
  0xa8   : > { %3343 = vmatpush3.bf16.xpose.msk.msra.mxu0 %vm4010_vm1, %v3341_v10  ;;  %v1386_v45 = vmul.f32 %v3052_v19, %v1258_v26  ;;  %v1385_v46 = vmul.f32 %v3051_v20, %v1257_v8  ;;  %v1264_v10 = vmul.f32 %v4098_v56, %v3883_v51  ;;  %v3233_v19 = vld [vmem:[%s3815_s28 + $0xe8] sm:$0xff]   ;;  %v1629_v20 = vsel %vm1463_vm0, %v1390_v58, 0.0 }
  0xa9   : > { %3344 = vmatprep.subr.bf16.mxu0 %v3541_v28  ;;  %v3068_v26 = vunpack.c.h.bf16 %v3233_v19  ;;  %v1266_v8 = vmul.f32 %v4098_v56, %v3896_v62 }
  0xaa   : > { %1588 = vadd.xlane.f32.xlu1 %v1587_v27  ;;  %1585 = vadd.xlane.f32.xlu0 %v1584_v29  ;;  %v3230_v27 = vld [vmem:[%s3815_s28 + $0xd0] sm:$0xff]   ;;  %v1617_v55 = vsel %vm1463_vm0, %v1386_v45, 0.0  ;;  %v1614_v17 = vsel %vm1463_vm0, %v1385_v46, 0.0 }
  0xab   : > { %v3056_v29 = vunpack.c.h.bf16 %v3230_v27  ;;  %v3055_v32 = vunpack.c.l.bf16 %v3230_v27  ;;  %v3067_v27 = vunpack.c.l.bf16 %v3233_v19 }
  0xad   : > { %v1388_v53 = vmul.f32 %v3056_v29, %v1260_v30  ;;  %v3234_v29 = vld [vmem:[%s3815_s28 + $0xf0] sm:$0xff]  }
  0xae   : > { %1594 = vadd.xlane.f32.xlu1 %v1593_v54  ;;  %1591 = vadd.xlane.f32.xlu0 %v1590_v31  ;;  %v3059_v54 = vunpack.c.l.bf16 %v3231_v35  ;;  %v1261_v31 = vmul.f32 %v4098_v56, %v3871_v39  ;;  %v3072_v35 = vunpack.c.h.bf16 %v3234_v29  ;;  %v3071_v41 = vunpack.c.l.bf16 %v3234_v29 }
  0xaf   : > { %v1623_v59 = vsel %vm1463_vm0, %v1388_v53, 0.0 }
  0xb0   : > { %3347 = vmatpush3.bf16.xpose.msk.msra.mxu0 %vm4010_vm1, %v3345_v50  ;;  %v1389_v60 = vmul.f32 %v3059_v54, %v1261_v31  ;;  %v1396_v53 = vmul.f32 %v3072_v35, %v1268_v40  ;;  %v1270_v31 = vmul.f32 %v4098_v56, %v3927_v36 }
  0xb1   : > { %3348 = vmatprep.subr.bf16.mxu0 %v3541_v28  ;;  %v4160_v28 = vrot.slane %v1118_v1, %v3800_v5  ;;  %v3080_v1 = vunpack.c.h.bf16 %v3236_v33  ;;  %v3242_v33 = vld [vmem:[%s3815_s28 + $0x130] sm:$0xff]  }
  0xb2   : > { %1600 = vadd.xlane.f32.xlu1 %v1599_v57  ;;  %1597 = vadd.xlane.f32.xlu0 %v1596_v61  ;;  %v1387_v57 = vmul.f32 %v3055_v32, %v1259_v34  ;;  %v3064_v61 = vunpack.c.h.bf16 %v3232_v49  ;;  %v1626_v12 = vsel %vm1463_vm0, %v1389_v60, 0.0  ;;  %v1265_v34 = vmul.f32 %v4098_v56, %v3899_v63 }
  0xb3   : > { %v4173_v50 = vrot.slane %v4160_v28, %v3800_v5  ;;  %v1398_v60 = vmul.f32 %v3076_v42, %v1270_v31  ;;  %v3241_v31 = vld [vmem:[%s3815_s28 + $0x128] sm:$0xff]  }
  0xb4   : > { %v1620_v7 = vsel %vm1463_vm0, %v1387_v57, 0.0  ;;  %v1392_v30 = vmul.f32 %v3064_v61, %v1264_v10  ;;  %v1393_v47 = vmul.f32 %v3067_v27, %v1265_v34  ;;  %v3237_v10 = vld [vmem:[%s3815_s28 + $0x108] sm:$0xff]  }
  0xb5   : > { %v4183_v58 = vrot.slane %v4173_v50, %v3823_v9  ;;  %v3083_v19 = vunpack.c.l.bf16 %v3237_v10 }
  0xb6   : > { %1606 = vadd.xlane.f32.xlu1 %v1605_v13  ;;  %1603 = vadd.xlane.f32.xlu0 %v1602_v18  ;;  %v3063_v13 = vunpack.c.l.bf16 %v3232_v49  ;;  %v1263_v18 = vmul.f32 %v4098_v56, %v3886_v52  ;;  %v1635_v45 = vsel %vm1463_vm0, %v1392_v30, 0.0  ;;  %v1638_v49 = vsel %vm1463_vm0, %v1393_v47, 0.0 }
  0xb7   : > { %v1272_v2 = vmul.f32 %v4183_v58, %v3840_v16  ;;  %v1273_v16 = vmul.f32 %v4183_v58, %v3827_v11  ;;  %v1276_v29 = vmul.f32 %v4183_v58, %v3847_v21  ;;  %v1275_v30 = vmul.f32 %v4183_v58, %v3851_v23 }
  0xb8   : > { %v1391_v32 = vmul.f32 %v3063_v13, %v1263_v18  ;;  %3351 = vmatpush3.bf16.xpose.msk.msra.mxu0 %vm4010_vm1, %v3349_v22  ;;  %v3084_v18 = vunpack.c.h.bf16 %v3237_v10  ;;  %v1278_v34 = vmul.f32 %v4183_v58, %v3867_v37  ;;  %v4215_v23 = vand.u32 127, %v1122_v0 }
  0xb9   : > { %v1400_v22 = vmul.f32 %v3080_v1, %v1272_v2  ;;  %v1401_v40 = vmul.f32 %v3083_v19, %v1273_v16  ;;  %v1279_v42 = vmul.f32 %v4183_v58, %v3886_v52  ;;  %v1281_v52 = vmul.f32 %v4183_v58, %v3899_v63 }
  0xba   : > { %1612 = vadd.xlane.f32.xlu1 %v1611_v43  ;;  %1609 = vadd.xlane.f32.xlu0 %v1608_v44  ;;  %v1267_v43 = vmul.f32 %v4098_v56, %v3914_v25  ;;  %v1394_v44 = vmul.f32 %v3068_v26, %v1266_v8  ;;  %v1632_v46 = vsel %vm1463_vm0, %v1391_v32, 0.0  ;;  %v1274_v26 = vmul.f32 %v4183_v58, %v3837_v15 }
  0xbb   : > { %v1659_v15 = vsel %vm1463_vm0, %v1400_v22, 0.0  ;;  %v1989_v0 = vadd.s32 4294967280, %v4215_v23  ;;  %v1982_v2 = vadd.s32 4294967288, %v4215_v23  ;;  %v1284_v10 = vmul.f32 %v4183_v58, %v3911_v24 }
  0xbc   : > { %v1395_v54 = vmul.f32 %v3071_v41, %v1267_v43  ;;  %v1641_v57 = vsel %vm1463_vm0, %v1394_v44, 0.0  ;;  %v1402_v35 = vmul.f32 %v3084_v18, %v1274_v26  ;;  %v1277_v43 = vmul.f32 %v4183_v58, %v3871_v39  ;;  %v3240_v44 = vld [vmem:[%s3815_s28 + $0x120] sm:$0xff]   ;;  %v3243_v18 = vld [vmem:[%s3815_s28 + $0x138] sm:$0xff]  }
  0xbd   : > { %v3095_v39 = vunpack.c.l.bf16 %v3240_v44  ;;  %v2010_v63 = vadd.s32 4294967256, %v4215_v23  ;;  %v1134_v19 = vcombine.high %v4160_v28, %v4160_v28  ;;  %v2003_v26 = vadd.s32 4294967264, %v4215_v23 }
  0xbe   : > { %1618 = vadd.xlane.f32.xlu1 %v1617_v55  ;;  %1615 = vadd.xlane.f32.xlu0 %v1614_v17  ;;  %v3075_v55 = vunpack.c.l.bf16 %v3235_v48  ;;  %v1269_v17 = vmul.f32 %v4098_v56, %v3930_v38  ;;  %v1644_v56 = vsel %vm1463_vm0, %v1395_v54, 0.0  ;;  %v1665_v37 = vsel %vm1463_vm0, %v1402_v35, 0.0 }
  0xbf   : > { %3318 = vmatmul.mubr.msk.f32.vlgmr.msra.gmra.mrb[0].mxu0 %vm1463_vm0, %v3813_v6  ;;  %v1653_v6 = vsel %vm1463_vm0, %v1398_v60, 0.0  ;;  %v3096_v48 = vunpack.c.h.bf16 %v3240_v44  ;;  %v1280_v54 = vmul.f32 %v4183_v58, %v3883_v51  ;;  %v1282_v51 = vmul.f32 %v4183_v58, %v3896_v62 }
  0xc0   : > { %v1397_v61 = vmul.f32 %v3075_v55, %v1269_v17  ;;  %v1407_v1 = vmul.f32 %v3095_v39, %v1279_v42  ;;  %v3104_v62 = vunpack.c.h.bf16 %v3242_v33  ;;  %v2024_v28 = vadd.s32 4294967240, %v4215_v23 }
  0xc1   : > { %v2038_v44 = vadd.s32 4294967224, %v4215_v23  ;;  %vm2078_vm1 = vcmask 982912  }
  0xc2   : > { %1624 = vadd.xlane.f32.xlu1 %v1623_v59  ;;  %1621 = vadd.xlane.f32.xlu0 %v1620_v7  ;;  %v1647_v59 = vsel %vm1463_vm0, %v1396_v53, 0.0  ;;  %v1271_v7 = vmul.f32 %v4183_v58, %v3834_v14  ;;  %v1650_v13 = vsel %vm1463_vm0, %v1397_v61, 0.0  ;;  %v3239_v14 = vld [vmem:[%s3815_s28 + $0x118] sm:$0xff]   ;;  %v1408_v61 = vmul.f32 %v3096_v48, %v1280_v54 }
  0xc3   : > { %v3092_v32 = vunpack.c.h.bf16 %v3239_v14  ;;  %v3091_v41 = vunpack.c.l.bf16 %v3239_v14  ;;  %v1680_v16 = vsel %vm1463_vm0, %v1407_v1, 0.0  ;;  %v4258_v14 = vsub.s32 %v1982_v2, %v3794_v3  ;;  %v4314_v1 = vld [vmem:[%s3811_s27 + $0x8] sm:$0xff] }
  0xc4   : > { %v1683_v24 = vsel %vm1463_vm0, %v1408_v61, 0.0 }
  0xc5   : > { %v1406_v47 = vmul.f32 %v3092_v32, %v1278_v34  ;;  %v1405_v53 = vmul.f32 %v3091_v41, %v1277_v43  ;;  %v4264_v32 = vsub.s32 %v2010_v63, %v3794_v3  ;;  %v4273_v41 = vsub.s32 %v2003_v26, %v3794_v3  ;;  %v3252_v63 = vld [vmem:[%s3815_s28 + $0x180] sm:$0xff]   ;;  %v4331_v26 = vld [vmem:[%s3811_s27 + $0x10] sm:$0xff] }
  0xc6   : > { %1630 = vadd.xlane.f32.xlu1 %v1629_v20  ;;  %1627 = vadd.xlane.f32.xlu0 %v1626_v12  ;;  %v3238_v20 = vld [vmem:[%s3815_s28 + $0x110] sm:$0xff]   ;;  %v1399_v12 = vmul.f32 %v3079_v4, %v1271_v7  ;;  %v4237_v4 = vsub.s32 %v1989_v0, %v3794_v3  ;;  %v4241_v7 = vsub.s32 %v4215_v23, %v3794_v3 }
  0xc7   : > { %v3088_v8 = vunpack.c.h.bf16 %v3238_v20  ;;  %v3087_v27 = vunpack.c.l.bf16 %v3238_v20  ;;  %v1674_v60 = vsel %vm1463_vm0, %v1405_v53, 0.0  ;;  %v1285_v43 = vmul.f32 %v4183_v58, %v3930_v38 }
  0xc8   : > { %v1656_v11 = vsel %vm1463_vm0, %v1399_v12, 0.0 }
  0xc9   : > { %v1404_v21 = vmul.f32 %v3088_v8, %v1276_v29  ;;  %v3108_v8 = vunpack.c.h.bf16 %v3243_v18 }
  0xca   : > { %1636 = vadd.xlane.f32.xlu1 %v1635_v45  ;;  %1633 = vadd.xlane.f32.xlu0 %v1632_v46  ;;  %v1662_v45 = vsel %vm1463_vm0, %v1401_v40, 0.0  ;;  %v1403_v46 = vmul.f32 %v3087_v27, %v1275_v30  ;;  %v1286_v27 = vmul.f32 %v4183_v58, %v3927_v36  ;;  %v3107_v36 = vunpack.c.l.bf16 %v3243_v18 }
  0xcb   : > { %v1671_v55 = vsel %vm1463_vm0, %v1404_v21, 0.0  ;;  %v4280_v21 = vsub.s32 %v2024_v28, %v3794_v3  ;;  %v3143_v28 = vunpack.c.l.bf16 %v3252_v63 }
  0xcc   : > { %v1668_v17 = vsel %vm1463_vm0, %v1403_v46, 0.0  ;;  %v1164_v46 = vcombine.high %v4173_v50, %v4173_v50  ;;  %v1413_v0 = vmul.f32 %v3107_v36, %v1285_v43 }
  0xce   : > { %1642 = vadd.xlane.f32.xlu1 %v1641_v57  ;;  %1639 = vadd.xlane.f32.xlu0 %v1638_v49  ;;  %v1677_v57 = vsel %vm1463_vm0, %v1406_v47, 0.0  ;;  %v1996_v49 = vadd.s32 4294967272, %v4215_v23 }
  0xd0   : > { %v4252_v20 = vsub.s32 %v1996_v49, %v3794_v3 }
  0xd2   : > { %1648 = vadd.xlane.f32.xlu1 %v1647_v59  ;;  %1645 = vadd.xlane.f32.xlu0 %v1644_v56  ;;  %v3100_v59 = vunpack.c.h.bf16 %v3241_v31  ;;  %v3099_v56 = vunpack.c.l.bf16 %v3241_v31 }
  0xd4   : > { %v1410_v22 = vmul.f32 %v3100_v59, %v1282_v51  ;;  %v1409_v12 = vmul.f32 %v3099_v56, %v1281_v52  ;;  %v4304_v59 = vrot.slane %v1164_v46, %v3823_v9  ;;  %v4307_v51 = vld [vmem:[%s3815_s28 + $0x148] sm:$0xff]   ;;  %v4351_v46 = vld [vmem:[%s3811_s27 + $0x18] sm:$0xff] }
  0xd6   : > { %1654 = vadd.xlane.f32.xlu1 %v1653_v6  ;;  %1651 = vadd.xlane.f32.xlu0 %v1650_v13  ;;  %v3103_v6 = vunpack.c.l.bf16 %v3242_v33  ;;  %v1283_v13 = vmul.f32 %v4183_v58, %v3914_v25  ;;  %v1412_v25 = vmul.f32 %v3104_v62, %v1284_v10  ;;  %v1689_v35 = vsel %vm1463_vm0, %v1410_v22, 0.0  ;;  %v4319_v62 = vld [vmem:[%s3811_s27] sm:$0xff] }
  0xd7   : > { %v1686_v40 = vsel %vm1463_vm0, %v1409_v12, 0.0  ;;  %v2031_v58 = vadd.s32 4294967232, %v4215_v23  ;;  %v1698_v22 = vsel %vm1463_vm0, %v1413_v0, 0.0  ;;  %v3115_v12 = vunpack.c.l.bf16 %v4307_v51 }
  0xd8   : > { %v1411_v34 = vmul.f32 %v3103_v6, %v1283_v13 }
  0xd9   : > { %v4311_v61 = vsub.s32 %v2031_v58, %v3794_v3  ;;  %v1304_v58 = vmul.f32 %v4314_v1, %v4304_v59 }
  0xda   : > { %1660 = vadd.xlane.f32.xlu1 %v1659_v15  ;;  %1657 = vadd.xlane.f32.xlu0 %v1656_v11  ;;  %v2017_v15 = vadd.s32 4294967248, %v4215_v23  ;;  %v4268_v11 = vrot.slane %v1134_v19, %v3800_v5  ;;  %v1695_v5 = vsel %vm1463_vm0, %v1412_v25, 0.0  ;;  %v1692_v53 = vsel %vm1463_vm0, %v1411_v34, 0.0 }
  0xdb   : > { %v2052_v19 = vadd.s32 4294967208, %v4215_v23  ;;  %v2045_v25 = vadd.s32 4294967216, %v4215_v23 }
  0xdc   : > { %v4287_v38 = vsub.s32 %v2017_v15, %v3794_v3  ;;  %v4292_v54 = vrot.slane %v4268_v11, %v3823_v9 }
  0xdd   : > { %v4345_v43 = vsub.s32 %v2052_v19, %v3794_v3 }
  0xde   : > { %1666 = vadd.xlane.f32.xlu1 %v1665_v37  ;;  %1663 = vadd.xlane.f32.xlu0 %v1662_v45  ;;  %v1414_v37 = vmul.f32 %v3108_v8, %v1286_v27  ;;  %v3244_v45 = vld [vmem:[%s3815_s28 + $0x140] sm:$0xff]   ;;  %v1288_v2 = vmul.f32 %v4314_v1, %v4292_v54  ;;  %v1287_v10 = vmul.f32 %v4319_v62, %v4292_v54 }
  0xdf   : > { %v3111_v33 = vunpack.c.l.bf16 %v3244_v45  ;;  %v1303_v8 = vmul.f32 %v4319_v62, %v4304_v59 }
  0xe0   : > { %v1701_v49 = vsel %vm1463_vm0, %v1414_v37, 0.0  ;;  %v2059_v37 = vadd.s32 4294967200, %v4215_v23 }
  0xe1   : > { %v1415_v15 = vmul.f32 %v3111_v33, %v1287_v10 }
  0xe2   : > { %1672 = vadd.xlane.f32.xlu1 %v1671_v55  ;;  %1669 = vadd.xlane.f32.xlu0 %v1668_v17  ;;  %v4299_v55 = vsub.s32 %v2038_v44, %v3794_v3  ;;  %v3112_v17 = vunpack.c.h.bf16 %v3244_v45  ;;  %v2066_v44 = vadd.s32 4294967192, %v4215_v23  ;;  %v3116_v45 = vunpack.c.h.bf16 %v4307_v51 }
  0xe3   : > { %v1704_v0 = vsel %vm1463_vm0, %v1415_v15, 0.0  ;;  %v4370_v51 = vsub.s32 %v2045_v25, %v3794_v3  ;;  %v1305_v25 = vmul.f32 %v4331_v26, %v4304_v59 }
  0xe4   : > { %v1416_v34 = vmul.f32 %v3112_v17, %v1288_v2  ;;  %v4362_v17 = vld [vmem:[%s3815_s28 + $0x1c0] sm:$0xff]   ;;  %v4380_v2 = vsub.s32 %v2059_v37, %v3794_v3 }
  0xe6   : > { %1678 = vadd.xlane.f32.xlu1 %v1677_v57  ;;  %1675 = vadd.xlane.f32.xlu0 %v1674_v60 }
  0xe7   : > { %v1472_v29 = vpop.xlane.xlu1 %1471  ;;  %v1466_v30 = vpop.xlane.xlu0 %1465 }
  0xe8   : > { %v1981_v39 = vrot.slane %v1466_v30, %v4241_v7  ;;  %v1993_v31 = vrot.slane %v1472_v29, %v4237_v4 }
  0xea   : > { %1684 = vadd.xlane.f32.xlu1 %v1683_v24  ;;  %1681 = vadd.xlane.f32.xlu0 %v1680_v16  ;;  %v1289_v24 = vmul.f32 %v4331_v26, %v4292_v54 }
  0xeb   : > { %v1475_v47 = vpop.xlane.xlu1 %1474  ;;  %v1469_v48 = vpop.xlane.xlu0 %1468 }
  0xec   : > { %v2000_v42 = vrot.slane %v1475_v47, %v4252_v20  ;;  %v1986_v50 = vrot.slane %v1469_v48, %v4258_v14  ;;  %v1431_v48 = vmul.f32 %v3143_v28, %v1303_v8 }
  0xee   : > { %v1988_v57 = vsel %vm1987_vm3, %v1986_v50, %v1981_v39  ;;  %1690 = vadd.xlane.f32.xlu1 %v1689_v35  ;;  %1687 = vadd.xlane.f32.xlu0 %v1686_v40  ;;  %v1166_v35 = vcombine.high %v4268_v11, %v4268_v11  ;;  %v1290_v11 = vmul.f32 %v4351_v46, %v4292_v54 }
  0xef   : > { %v1995_v56 = vsel %vm1994_vm4, %v1993_v31, %v1988_v57  ;;  %v1481_v52 = vpop.xlane.xlu1 %1480  ;;  %v1478_v60 = vpop.xlane.xlu0 %1477  ;;  %v1707_v31 = vsel %vm1463_vm0, %v1416_v34, 0.0  ;;  %v4400_v34 = vld [vmem:[%s3811_s27 + $0x20] sm:$0xff] }
  0xf0   : > { %v2014_v6 = vrot.slane %v1481_v52, %v4264_v32  ;;  %v2002_v13 = vsel %vm2001_vm5, %v2000_v42, %v1995_v56  ;;  %v2007_v18 = vrot.slane %v1478_v60, %v4273_v41  ;;  %v4365_v57 = vrot.slane %v1166_v35, %v3823_v9  ;;  %v4373_v56 = vld [vmem:[%s3815_s28 + $0x188] sm:$0xff]  }
  0xf1   : > { %v4377_v60 = vsub.s32 %v2066_v44, %v3794_v3  ;;  %v1418_v9 = vmul.f32 %v3116_v45, %v1290_v11 }
  0xf2   : > { %v2009_v16 = vsel %vm2008_vm6, %v2007_v18, %v2002_v13  ;;  %1696 = vadd.xlane.f32.xlu1 %v1695_v5  ;;  %1693 = vadd.xlane.f32.xlu0 %v1692_v53  ;;  %v1417_v5 = vmul.f32 %v3115_v12, %v1289_v24  ;;  %v3144_v53 = vunpack.c.h.bf16 %v3252_v63  ;;  %v1752_v63 = vsel %vm1463_vm0, %v1431_v48, 0.0  ;;  %v4386_v18 = vld [vmem:[%s3815_s28 + $0x150] sm:$0xff]  }
  0xf3   : > { %v1487_v27 = vpop.xlane.xlu1 %1486  ;;  %v2016_v29 = vsel %vm2015_vm7, %v2014_v6, %v2009_v16  ;;  %v1484_v30 = vpop.xlane.xlu0 %1483  ;;  %v3175_v13 = vunpack.c.l.bf16 %v4362_v17  ;;  %v1319_v24 = vmul.f32 %v4319_v62, %v4365_v57  ;;  %v3147_v16 = vunpack.c.l.bf16 %v4373_v56 }
  0xf4   : > { %v2028_v40 = vrot.slane %v1487_v27, %v4280_v21  ;;  %v2021_v36 = vrot.slane %v1484_v30, %v4287_v38  ;;  %v1710_v52 = vsel %vm1463_vm0, %v1417_v5, 0.0  ;;  %v1432_v6 = vmul.f32 %v3144_v53, %v1304_v58 }
  0xf5   : > { %v2080_v27 = vadd.s32 4294967176, %v4215_v23  ;;  %v3119_v30 = vunpack.c.l.bf16 %v4386_v18  ;;  %v1291_v62 = vmul.f32 %v4400_v34, %v4292_v54  ;;  %v1713_v35 = vsel %vm1463_vm0, %v1418_v9, 0.0 }
  0xf6   : > { %v2023_v47 = vsel %vm2022_vm8, %v2021_v36, %v2016_v29  ;;  %1702 = vadd.xlane.f32.xlu1 %v1701_v49  ;;  %1699 = vadd.xlane.f32.xlu0 %v1698_v22  ;;  %v2073_v29 = vadd.s32 4294967184, %v4215_v23  ;;  %v3176_v36 = vunpack.c.h.bf16 %v4362_v17  ;;  %v4409_v23 = vld [vmem:[%s3815_s28 + $0x1c8] sm:$0xff]   ;;  %v1447_v45 = vmul.f32 %v3175_v13, %v1319_v24 }
  0xf7   : > { %v1493_v39 = vpop.xlane.xlu1 %1492  ;;  %v2030_v42 = vsel %vm2029_vm9, %v2028_v40, %v2023_v47  ;;  %v1490_v50 = vpop.xlane.xlu0 %1489  ;;  %v1755_v40 = vsel %vm1463_vm0, %v1432_v6, 0.0  ;;  %v1433_v11 = vmul.f32 %v3147_v16, %v1305_v25  ;;  %v1320_v47 = vmul.f32 %v4314_v1, %v4365_v57  ;;  %v4444_v24 = vld [vmem:[%s3811_s27 + $0x28] sm:$0xff] }
  0xf8   : > { %v2042_v49 = vrot.slane %v1493_v39, %v4299_v55  ;;  %v2035_v33 = vrot.slane %v1490_v50, %v4311_v61  ;;  %v4417_v58 = vsub.s32 %v2080_v27, %v3794_v3  ;;  %v4420_v39 = vsub.s32 %v2073_v29, %v3794_v3 }
  0xf9   : > { %v3179_v50 = vunpack.c.l.bf16 %v4409_v23  ;;  %v1321_v1 = vmul.f32 %v4331_v26, %v4365_v57  ;;  %v1306_v17 = vmul.f32 %v4351_v46, %v4304_v59  ;;  %v1800_v9 = vsel %vm1463_vm0, %v1447_v45, 0.0  ;;  %v4462_v45 = vld [vmem:[%s3815_s28 + $0x1d0] sm:$0xff]  }
  0xfa   : > { %v2037_v10 = vsel %vm2036_vm10, %v2035_v33, %v2030_v42  ;;  %1708 = vadd.xlane.f32.xlu1 %v1707_v31  ;;  %1705 = vadd.xlane.f32.xlu0 %v1704_v0  ;;  %v1419_v42 = vmul.f32 %v3119_v30, %v1291_v62  ;;  %v3148_v0 = vunpack.c.h.bf16 %v4373_v56  ;;  %v1307_v13 = vmul.f32 %v4400_v34, %v4304_v59  ;;  %v3247_v62 = vld [vmem:[%s3815_s28 + $0x158] sm:$0xff]  }
  0xfb   : > { %v1499_v19 = vpop.xlane.xlu1 %1498  ;;  %v2044_v22 = vsel %vm2043_vm11, %v2042_v49, %v2037_v10  ;;  %v1496_v12 = vpop.xlane.xlu0 %1495  ;;  %v4430_v49 = vld [vmem:[%s3815_s28 + $0x190] sm:$0xff]   ;;  %v1758_v10 = vsel %vm1463_vm0, %v1433_v11, 0.0  ;;  %v1292_v16 = vmul.f32 %v4444_v24, %v4292_v54  ;;  %v1449_v29 = vmul.f32 %v3179_v50, %v1321_v1 }
  0xfc   : > { %v2056_v28 = vrot.slane %v1499_v19, %v4345_v43  ;;  %v2049_v8 = vrot.slane %v1496_v12, %v4370_v51  ;;  %v3151_v56 = vunpack.c.l.bf16 %v4430_v49  ;;  %v3120_v12 = vunpack.c.h.bf16 %v4386_v18 }
  0xfd   : > { %v1434_v30 = vmul.f32 %v3148_v0, %v1306_v17  ;;  %v1322_v50 = vmul.f32 %v4351_v46, %v4365_v57  ;;  %v3183_v0 = vunpack.c.l.bf16 %v4462_v45  ;;  %v1323_v17 = vmul.f32 %v4400_v34, %v4365_v57 }
  0xfe   : > { %v2051_v15 = vsel %vm2050_vm12, %v2049_v8, %v2044_v22  ;;  %1753 = vadd.xlane.f32.xlu1 %v1752_v63  ;;  %1711 = vadd.xlane.f32.xlu0 %v1710_v52  ;;  %v1448_v63 = vmul.f32 %v3176_v36, %v1320_v47  ;;  %v1716_v22 = vsel %vm1463_vm0, %v1419_v42, 0.0  ;;  %v1420_v36 = vmul.f32 %v3120_v12, %v1292_v16 }
  0xff   : > { %v1505_v44 = vpop.xlane.xlu1 %1504  ;;  %v2058_v5 = vsel %vm2057_vm13, %v2056_v28, %v2051_v15  ;;  %v1502_v37 = vpop.xlane.xlu0 %1501  ;;  %v3180_v42 = vunpack.c.h.bf16 %v4409_v23  ;;  %v1308_v34 = vmul.f32 %v4444_v24, %v4304_v59 }
 0x100   : > { %v2070_v48 = vrot.slane %v1505_v44, %v4377_v60  ;;  %v2063_v53 = vrot.slane %v1502_v37, %v4380_v2  ;;  %v1803_v27 = vsel %vm1463_vm0, %v1448_v63, 0.0  ;;  %v3123_v44 = vunpack.c.l.bf16 %v3247_v62 }
 0x101   : > { %v1719_v23 = vsel %vm1463_vm0, %v1420_v36, 0.0 }
 0x102   : > { %v2065_v31 = vsel %vm4985_vm14, %v2063_v53, %v2058_v5  ;;  %1714 = vadd.xlane.f32.xlu1 %v1713_v35  ;;  %1756 = vadd.xlane.f32.xlu0 %v1755_v40  ;;  %v1435_v35 = vmul.f32 %v3151_v56, %v1307_v13  ;;  %v4457_v5 = vld [vmem:[%s3811_s27 + $0x30] sm:$0xff]  ;;  %v1761_v53 = vsel %vm1463_vm0, %v1434_v30, 0.0 }
 0x103   : > { %v1511_v3 = vpop.xlane.xlu1 %1510  ;;  %v2072_v33 = vsel %vm2071_vm15, %v2070_v48, %v2065_v31  ;;  %v1508_v52 = vpop.xlane.xlu0 %1507  ;;  %v1293_v37 = vmul.f32 %v4457_v5, %v4292_v54  ;;  %v1806_v48 = vsel %vm1463_vm0, %v1449_v29, 0.0  ;;  %v1309_v12 = vmul.f32 %v4457_v5, %v4304_v59 }
 0x104   : > { %v2084_v6 = vrot.slane %v1511_v3, %v4417_v58  ;;  %v2077_v26 = vrot.slane %v1508_v52, %v4420_v39 }
 0x105   : > { %v1421_v52 = vmul.f32 %v3123_v44, %v1293_v37 }
 0x106   : > { %v2079_v19 = vsel %vm2078_vm1, %v2077_v26, %v2072_v33  ;;  %1801 = vadd.xlane.f32.xlu1 %v1800_v9  ;;  %1759 = vadd.xlane.f32.xlu0 %v1758_v10  ;;  %v1764_v33 = vsel %vm1463_vm0, %v1435_v35, 0.0  ;;  %v4478_v9 = vld [vmem:[%s3815_s28 + $0x198] sm:$0xff]   ;;  %v3152_v26 = vunpack.c.h.bf16 %v4430_v49 }
 0x107   : > { %v4449_v25 = vsel %vm2085_vm2, %v2084_v6, %v2079_v19  ;;  %v1517_v28 = vpop.xlane.xlu1 %1516  ;;  %v1514_v8 = vpop.xlane.xlu0 %1513  ;;  %v1450_v6 = vmul.f32 %v3180_v42, %v1322_v50  ;;  %v1451_v19 = vmul.f32 %v3183_v0, %v1323_v17  ;;  %v4491_v49 = vld [vmem:[%s3811_s27 + $0x38] sm:$0xff] }
 0x108   : > { %v2094_v15 = vrot.slane %v1517_v28, %v4258_v14  ;;  %v2090_v18 = vrot.slane %v1514_v8, %v4241_v7  ;;  %v3124_v28 = vunpack.c.h.bf16 %v3247_v62  ;;  %v1294_v8 = vmul.f32 %v4491_v49, %v4292_v54  ;;  %v4512_v50 = vld [vmem:[%s3815_s28 + $0x1d8] sm:$0xff]  }
 0x109   : > { %v1436_v35 = vmul.f32 %v3152_v26, %v1308_v34  ;;  %v1812_v44 = vsel %vm1463_vm0, %v1451_v19, 0.0  ;;  %v4528_v34 = vld [vmem:[%s3815_s28 + $0x1a0] sm:$0xff]  }
 0x10a   : > { %v2095_v40 = vsel %vm1987_vm3, %v2094_v15, %v2090_v18  ;;  %1717 = vadd.xlane.f32.xlu1 %v1716_v22  ;;  %1804 = vadd.xlane.f32.xlu0 %v1803_v27  ;;  %v3155_v22 = vunpack.c.l.bf16 %v4478_v9  ;;  %v1722_v15 = vsel %vm1463_vm0, %v1421_v52, 0.0  ;;  %v1809_v18 = vsel %vm1463_vm0, %v1450_v6, 0.0 }
 0x10b   : > { %v1523_v11 = vpop.xlane.xlu1 %1522  ;;  %v1520_v47 = vpop.xlane.xlu0 %1519  ;;  %v1767_v17 = vsel %vm1463_vm0, %v1436_v35, 0.0 }
 0x10c   : > { %v2104_v31 = vrot.slane %v1523_v11, %v4252_v20  ;;  %v2099_v1 = vrot.slane %v1520_v47, %v4237_v4  ;;  %v1437_v37 = vmul.f32 %v3155_v22, %v1309_v12  ;;  %v1422_v47 = vmul.f32 %v3124_v28, %v1294_v8 }
 0x10d   : > { %v3156_v22 = vunpack.c.h.bf16 %v4478_v9  ;;  %v1310_v12 = vmul.f32 %v4491_v49, %v4304_v59  ;;  %v4542_v9 = vld [vmem:[%s3811_s27 + $0x48] sm:$0xff] }
 0x10e   : > { %v2100_v3 = vsel %vm1994_vm4, %v2099_v1, %v2095_v40  ;;  %1807 = vadd.xlane.f32.xlu1 %v1806_v48  ;;  %1762 = vadd.xlane.f32.xlu0 %v1761_v53  ;;  %v4499_v40 = vld [vmem:[%s3815_s28 + $0x160] sm:$0xff]   ;;  %v1725_v6 = vsel %vm1463_vm0, %v1422_v47, 0.0 }
 0x10f   : > { %v1529_v46 = vpop.xlane.xlu1 %1528  ;;  %v2105_v10 = vsel %vm2001_vm5, %v2104_v31, %v2100_v3  ;;  %v1526_v63 = vpop.xlane.xlu0 %1525  ;;  %v3127_v48 = vunpack.c.l.bf16 %v4499_v40  ;;  %v4507_v53 = vld [vmem:[%s3811_s27 + $0x40] sm:$0xff]  ;;  %v3184_v3 = vunpack.c.h.bf16 %v4462_v45  ;;  %v1325_v45 = vmul.f32 %v4457_v5, %v4365_v57 }
 0x110   : > { %v2114_v56 = vrot.slane %v1529_v46, %v4264_v32  ;;  %v2109_v13 = vrot.slane %v1526_v63, %v4273_v41  ;;  %v1295_v42 = vmul.f32 %v4507_v53, %v4292_v54  ;;  %v1770_v46 = vsel %vm1463_vm0, %v1437_v37, 0.0 }
 0x111   : > { %v3159_v5 = vunpack.c.l.bf16 %v4528_v34  ;;  %v1311_v8 = vmul.f32 %v4507_v53, %v4304_v59 }
 0x112   : > { %v2110_v16 = vsel %vm2008_vm6, %v2109_v13, %v2105_v10  ;;  %1765 = vadd.xlane.f32.xlu1 %v1764_v33  ;;  %1720 = vadd.xlane.f32.xlu0 %v1719_v23  ;;  %v1324_v33 = vmul.f32 %v4444_v24, %v4365_v57  ;;  %v3187_v10 = vunpack.c.l.bf16 %v4512_v50  ;;  %v1423_v26 = vmul.f32 %v3127_v48, %v1295_v42 }
 0x113   : > { %v1535_v27 = vpop.xlane.xlu1 %1534  ;;  %v2115_v29 = vsel %vm2015_vm7, %v2114_v56, %v2110_v16  ;;  %v1532_v30 = vpop.xlane.xlu0 %1531  ;;  %v1439_v48 = vmul.f32 %v3159_v5, %v1311_v8  ;;  %v3160_v8 = vunpack.c.h.bf16 %v4528_v34 }
 0x114   : > { %v2124_v62 = vrot.slane %v1535_v27, %v4280_v21  ;;  %v2119_v36 = vrot.slane %v1532_v30, %v4287_v38  ;;  %v1452_v19 = vmul.f32 %v3184_v3, %v1324_v33  ;;  %v3128_v30 = vunpack.c.h.bf16 %v4499_v40  ;;  %v4563_v33 = vld [vmem:[%s3815_s28 + $0x1e0] sm:$0xff]  }
 0x116   : > { %v2120_v11 = vsel %vm2022_vm8, %v2119_v36, %v2115_v29  ;;  %1723 = vadd.xlane.f32.xlu1 %v1722_v15  ;;  %1810 = vadd.xlane.f32.xlu0 %v1809_v18  ;;  %v1453_v29 = vmul.f32 %v3187_v10, %v1325_v45  ;;  %v1296_v15 = vmul.f32 %v4542_v9, %v4292_v54  ;;  %v4547_v18 = vld [vmem:[%s3815_s28 + $0x168] sm:$0xff]   ;;  %v1815_v37 = vsel %vm1463_vm0, %v1452_v19, 0.0 }
 0x117   : > { %v1541_v31 = vpop.xlane.xlu1 %1540  ;;  %v2125_v1 = vsel %vm2029_vm9, %v2124_v62, %v2120_v11  ;;  %v1538_v0 = vpop.xlane.xlu0 %1537  ;;  %v1438_v11 = vmul.f32 %v3156_v22, %v1310_v12  ;;  %v3131_v42 = vunpack.c.l.bf16 %v4547_v18 }
 0x118   : > { %v2134_v23 = vrot.slane %v1541_v31, %v4299_v55  ;;  %v2129_v52 = vrot.slane %v1538_v0, %v4311_v61  ;;  %v1424_v0 = vmul.f32 %v3128_v30, %v1296_v15 }
 0x119   : > { %v1773_v10 = vsel %vm1463_vm0, %v1438_v11, 0.0 }
 0x11a   : > { %v2130_v63 = vsel %vm2036_vm10, %v2129_v52, %v2125_v1  ;;  %1813 = vadd.xlane.f32.xlu1 %v1812_v44  ;;  %1768 = vadd.xlane.f32.xlu0 %v1767_v17  ;;  %v1728_v44 = vsel %vm1463_vm0, %v1423_v26, 0.0  ;;  %v1818_v1 = vsel %vm1463_vm0, %v1453_v29, 0.0  ;;  %v4558_v17 = vld [vmem:[%s3811_s27 + $0x50] sm:$0xff]  ;;  %v1731_v19 = vsel %vm1463_vm0, %v1424_v0, 0.0 }
 0x11b   : > { %v1547_v24 = vpop.xlane.xlu1 %1546  ;;  %v2135_v56 = vsel %vm2043_vm11, %v2134_v23, %v2130_v63  ;;  %v1544_v13 = vpop.xlane.xlu0 %1543  ;;  %v1297_v3 = vmul.f32 %v4558_v17, %v4292_v54  ;;  %v3188_v63 = vunpack.c.h.bf16 %v4512_v50  ;;  %v1327_v50 = vmul.f32 %v4507_v53, %v4365_v57 }
 0x11c   : > { %v2144_v16 = vrot.slane %v1547_v24, %v4345_v43  ;;  %v2139_v28 = vrot.slane %v1544_v13, %v4370_v51  ;;  %v1776_v24 = vsel %vm1463_vm0, %v1439_v48, 0.0 }
 0x11d   : > { %v1425_v22 = vmul.f32 %v3131_v42, %v1297_v3 }
 0x11e   : > { %v2140_v27 = vsel %vm2050_vm12, %v2139_v28, %v2135_v56  ;;  %1771 = vadd.xlane.f32.xlu1 %v1770_v46  ;;  %1726 = vadd.xlane.f32.xlu0 %v1725_v6  ;;  %v1326_v6 = vmul.f32 %v4491_v49, %v4365_v57  ;;  %v3191_v56 = vunpack.c.l.bf16 %v4563_v33  ;;  %v4579_v49 = vld [vmem:[%s3815_s28 + $0x1a8] sm:$0xff]  }
 0x11f   : > { %v1553_v35 = vpop.xlane.xlu1 %1552  ;;  %v2145_v62 = vsel %vm2057_vm13, %v2144_v16, %v2140_v27  ;;  %v1550_v36 = vpop.xlane.xlu0 %1549  ;;  %v1312_v27 = vmul.f32 %v4542_v9, %v4304_v59  ;;  %v3163_v15 = vunpack.c.l.bf16 %v4579_v49 }
 0x120   : > { %v2154_v40 = vrot.slane %v1553_v35, %v4377_v60  ;;  %v2149_v47 = vrot.slane %v1550_v36, %v4380_v2  ;;  %v1454_v5 = vmul.f32 %v3188_v63, %v1326_v6  ;;  %v1313_v35 = vmul.f32 %v4558_v17, %v4304_v59  ;;  %v4617_v63 = vld [vmem:[%s3815_s28 + $0x1e8] sm:$0xff]  }
 0x121   : > { %v1455_v34 = vmul.f32 %v3191_v56, %v1327_v50  ;;  %v3132_v36 = vunpack.c.h.bf16 %v4547_v18  ;;  %v1440_v42 = vmul.f32 %v3160_v8, %v1312_v27  ;;  %v3192_v56 = vunpack.c.h.bf16 %v4563_v33  ;;  %v4633_v8 = vld [vmem:[%s3815_s28 + $0x1b0] sm:$0xff]  }
 0x122   : > { %v2150_v31 = vsel %vm4985_vm14, %v2149_v47, %v2145_v62  ;;  %1729 = vadd.xlane.f32.xlu1 %v1728_v44  ;;  %1816 = vadd.xlane.f32.xlu0 %v1815_v37  ;;  %vm2640_vm14 = vcmask 1041409   ;;  %v4597_v44 = vld [vmem:[%s3811_s27 + $0x58] sm:$0xff]  ;;  %v4602_v37 = vld [vmem:[%s3815_s28 + $0x170] sm:$0xff]   ;;  %v1734_v47 = vsel %vm1463_vm0, %v1425_v22, 0.0  ;;  %v1821_v48 = vsel %vm1463_vm0, %v1454_v5, 0.0 }
 0x123   : > { %v1559_v23 = vpop.xlane.xlu1 %1558  ;;  %v2155_v52 = vsel %vm2071_vm15, %v2154_v40, %v2150_v31  ;;  %v1556_v46 = vpop.xlane.xlu0 %1555  ;;  %v3135_v0 = vunpack.c.l.bf16 %v4602_v37  ;;  %v3195_v50 = vunpack.c.l.bf16 %v4617_v63 }
 0x124   : > { %v2164_v26 = vrot.slane %v1559_v23, %v4417_v58  ;;  %v2159_v45 = vrot.slane %v1556_v46, %v4420_v39  ;;  %v1824_v23 = vsel %vm1463_vm0, %v1455_v34, 0.0  ;;  %v4612_v46 = vld [vmem:[%s3811_s27 + $0x60] sm:$0xff] }
 0x126   : > { %v2160_v13 = vsel %vm2078_vm1, %v2159_v45, %v2155_v52  ;;  %1819 = vadd.xlane.f32.xlu1 %v1818_v1  ;;  %1774 = vadd.xlane.f32.xlu0 %v1773_v10  ;;  %v1441_v1 = vmul.f32 %v3163_v15, %v1313_v35  ;;  %v1299_v10 = vmul.f32 %v4612_v46, %v4292_v54  ;;  %v3164_v15 = vunpack.c.h.bf16 %v4579_v49 }
 0x127   : > { %v2165_v12 = vsel %vm2085_vm2, %v2164_v26, %v2160_v13  ;;  %v1565_v16 = vpop.xlane.xlu1 %1564  ;;  %v1562_v28 = vpop.xlane.xlu0 %1561  ;;  %v1328_v13 = vmul.f32 %v4542_v9, %v4365_v57  ;;  %v3136_v49 = vunpack.c.h.bf16 %v4602_v37 }
 0x128   : > { %v4587_v29 = vsel %vm2640_vm14, %v2165_v12, %v4449_v25  ;;  %v2173_v53 = vrot.slane %v1565_v16, %v4258_v14  ;;  %v2169_v30 = vrot.slane %v1562_v28, %v4241_v7  ;;  %v1298_v25 = vmul.f32 %v4597_v44, %v4292_v54 }
 0x129   : > { %v1329_v12 = vmul.f32 %v4558_v17, %v4365_v57  ;;  %v1782_v28 = vsel %vm1463_vm0, %v1441_v1, 0.0  ;;  %v1427_v5 = vmul.f32 %v3135_v0, %v1299_v10  ;;  %v1314_v17 = vmul.f32 %v4597_v44, %v4304_v59 }
 0x12a   : > { %v2174_v62 = vsel %vm1987_vm3, %v2173_v53, %v2169_v30  ;;  %1777 = vadd.xlane.f32.xlu1 %v1776_v24  ;;  %1732 = vadd.xlane.f32.xlu0 %v1731_v19  ;;  %v1426_v52 = vmul.f32 %v3132_v36, %v1298_v25  ;;  %v1779_v24 = vsel %vm1463_vm0, %v1440_v42, 0.0  ;;  %v1456_v30 = vmul.f32 %v3192_v56, %v1328_v13  ;;  %v4668_v13 = vld [vmem:[%s3815_s28 + $0x1f0] sm:$0xff]  }
 0x12b   : > { %v1571_v11 = vpop.xlane.xlu1 %1570  ;;  %v1568_v40 = vpop.xlane.xlu0 %1567  ;;  %v1457_v34 = vmul.f32 %v3195_v50, %v1329_v12  ;;  %v3167_v36 = vunpack.c.l.bf16 %v4633_v8  ;;  %v1315_v25 = vmul.f32 %v4612_v46, %v4304_v59  ;;  %v1442_v0 = vmul.f32 %v3164_v15, %v1314_v17  ;;  %v3259_v17 = vld [vmem:[%s3815_s28 + $0x1b8] sm:$0xff]  }
 0x12c   : > { %v2183_v31 = vrot.slane %v1571_v11, %v4252_v20  ;;  %v2178_v18 = vrot.slane %v1568_v40, %v4237_v4  ;;  %v1737_v33 = vsel %vm1463_vm0, %v1426_v52, 0.0  ;;  %v4647_v40 = vld [vmem:[%s3811_s27 + $0x68] sm:$0xff]  ;;  %v1827_v1 = vsel %vm1463_vm0, %v1456_v30, 0.0 }
 0x12d   : > { %v1830_v52 = vsel %vm1463_vm0, %v1457_v34, 0.0  ;;  %v1443_v10 = vmul.f32 %v3167_v36, %v1315_v25  ;;  %v1785_v12 = vsel %vm1463_vm0, %v1442_v0, 0.0  ;;  %v3168_v36 = vunpack.c.h.bf16 %v4633_v8 }
 0x12e   : > { %v2179_v3 = vsel %vm1994_vm4, %v2178_v18, %v2174_v62  ;;  %1735 = vadd.xlane.f32.xlu1 %v1734_v47  ;;  %1822 = vadd.xlane.f32.xlu0 %v1821_v48  ;;  %v1300_v47 = vmul.f32 %v4647_v40, %v4292_v54  ;;  %v1740_v18 = vsel %vm1463_vm0, %v1427_v5, 0.0  ;;  %vm4991_vm14 = vcmask 851712  }
 0x12f   : > { %v1577_v6 = vpop.xlane.xlu1 %1576  ;;  %v2184_v26 = vsel %vm2001_vm5, %v2183_v31, %v2179_v3  ;;  %v1574_v45 = vpop.xlane.xlu0 %1573  ;;  %v4655_v3 = vld [vmem:[%s3815_s28 + $0x178] sm:$0xff]   ;;  %v1788_v30 = vsel %vm1463_vm0, %v1443_v10, 0.0 }
 0x130   : > { %v2193_v19 = vrot.slane %v1577_v6, %v4264_v32  ;;  %v2188_v22 = vrot.slane %v1574_v45, %v4273_v41  ;;  %v3139_v45 = vunpack.c.l.bf16 %v4655_v3  ;;  %v3140_v8 = vunpack.c.h.bf16 %v4655_v3 }
 0x132   : > { %v2189_v16 = vsel %vm2008_vm6, %v2188_v22, %v2184_v26  ;;  %1825 = vadd.xlane.f32.xlu1 %v1824_v23  ;;  %1780 = vadd.xlane.f32.xlu0 %v1779_v24  ;;  %v1428_v26 = vmul.f32 %v3136_v49, %v1300_v47  ;;  %v4663_v24 = vld [vmem:[%s3811_s27 + $0x70] sm:$0xff]  ;;  %v3171_v47 = vunpack.c.l.bf16 %v3259_v17 }
 0x133   : > { %v1583_v9 = vpop.xlane.xlu1 %1582  ;;  %v2194_v27 = vsel %vm2015_vm7, %v2193_v19, %v2189_v16  ;;  %v1580_v53 = vpop.xlane.xlu0 %1579  ;;  %v1301_v56 = vmul.f32 %v4663_v24, %v4292_v54  ;;  %v3196_v16 = vunpack.c.h.bf16 %v4617_v63 }
 0x134   : > { %v2203_v35 = vrot.slane %v1583_v9, %v4280_v21  ;;  %v2198_v62 = vrot.slane %v1580_v53, %v4287_v38  ;;  %v3199_v9 = vunpack.c.l.bf16 %v4668_v13  ;;  %v1743_v63 = vsel %vm1463_vm0, %v1428_v26, 0.0 }
 0x135   : > { %v1429_v15 = vmul.f32 %v3139_v45, %v1301_v56  ;;  %v3172_v56 = vunpack.c.h.bf16 %v3259_v17  ;;  %v1333_v17 = vmul.f32 %v4663_v24, %v4365_v57 }
 0x136   : > { %v2199_v11 = vsel %vm2022_vm8, %v2198_v62, %v2194_v27  ;;  %1783 = vadd.xlane.f32.xlu1 %v1782_v28  ;;  %1738 = vadd.xlane.f32.xlu0 %v1737_v33  ;;  %v1330_v28 = vmul.f32 %v4597_v44, %v4365_v57  ;;  %v1331_v27 = vmul.f32 %v4612_v46, %v4365_v57 }
 0x137   : > { %v1589_v48 = vpop.xlane.xlu1 %1588  ;;  %v2204_v42 = vsel %vm2029_vm9, %v2203_v35, %v2199_v11  ;;  %v1586_v31 = vpop.xlane.xlu0 %1585  ;;  %v1316_v46 = vmul.f32 %v4647_v40, %v4304_v59 }
 0x138   : > { %v2213_v37 = vrot.slane %v1589_v48, %v4299_v55  ;;  %v2208_v23 = vrot.slane %v1586_v31, %v4311_v61  ;;  %v1458_v34 = vmul.f32 %v3196_v16, %v1330_v28  ;;  %v1459_v49 = vmul.f32 %v3199_v9, %v1331_v27 }
 0x139   : > { %v1317_v31 = vmul.f32 %v4663_v24, %v4304_v59  ;;  %v1332_v9 = vmul.f32 %v4647_v40, %v4365_v57 }
 0x13a   : > { %v2209_v6 = vsel %vm2036_vm10, %v2208_v23, %v2204_v42  ;;  %1741 = vadd.xlane.f32.xlu1 %v1740_v18  ;;  %1828 = vadd.xlane.f32.xlu0 %v1827_v1  ;;  %v1746_v42 = vsel %vm1463_vm0, %v1429_v15, 0.0  ;;  %v1444_v23 = vmul.f32 %v3168_v36, %v1316_v46  ;;  %v1836_v45 = vsel %vm1463_vm0, %v1459_v49, 0.0 }
 0x13b   : > { %v1595_v19 = vpop.xlane.xlu1 %1594  ;;  %v2214_v22 = vsel %vm2043_vm11, %v2213_v37, %v2209_v6  ;;  %v1592_v50 = vpop.xlane.xlu0 %1591  ;;  %v1833_v37 = vsel %vm1463_vm0, %v1458_v34, 0.0 }
 0x13c   : > { %v2223_v33 = vrot.slane %v1595_v19, %v4345_v43  ;;  %v2218_v5 = vrot.slane %v1592_v50, %v4370_v51  ;;  %v1445_v19 = vmul.f32 %v3171_v47, %v1317_v31  ;;  %v3200_v50 = vunpack.c.h.bf16 %v4668_v13 }
 0x13e   : > { %v2219_v53 = vsel %vm2050_vm12, %v2218_v5, %v2214_v22  ;;  %1831 = vadd.xlane.f32.xlu1 %v1830_v52  ;;  %1786 = vadd.xlane.f32.xlu0 %v1785_v12  ;;  %v3443_v52 = vld [vmem:[%s3811_s27 + $0x78] sm:$0xff]  ;;  %s2777_s27 = scalar_lea.sflag [#allocation4], %s3788_s5 }
 0x13f   : > { %v1601_v44 = vpop.xlane.xlu1 %1600  ;;  %v2224_v35 = vsel %vm2057_vm13, %v2223_v33, %v2219_v53  ;;  %v1598_v62 = vpop.xlane.xlu0 %1597  ;;  %v1302_v10 = vmul.f32 %v3443_v52, %v4292_v54  ;;  %v1318_v22 = vmul.f32 %v3443_v52, %v4304_v59  ;;  %v3267_v12 = vld [vmem:[%s3815_s28 + $0x1f8] sm:$0xff]   ;;  %v1791_v33 = vsel %vm1463_vm0, %v1444_v23, 0.0  ;;  %s3444_s28 = scalar_lea.vmem %s4928_s14, 128 }
 0x140   : > { %v2233_v25 = vrot.slane %v1601_v44, %v4377_v60  ;;  %v2228_v11 = vrot.slane %v1598_v62, %v4380_v2  ;;  %v3203_v13 = vunpack.c.l.bf16 %v3267_v12  ;;  %v3204_v62 = vunpack.c.h.bf16 %v3267_v12  ;;  %p3445_p3 = scmp.ne.s32.totalorder %s4928_s14, %s3444_s28  ;;  %p3452_p7 = scmp.lt.s32.totalorder %s3450_s10, %s3444_s28 }
 0x141   : > { %v1430_v5 = vmul.f32 %v3140_v8, %v1302_v10  ;;  %v1446_v15 = vmul.f32 %v3172_v56, %v1318_v22  ;;  %v1334_v34 = vmul.f32 %v3443_v52, %v4365_v57 }
 0x142   : > { %v2229_v48 = vsel %vm4991_vm14, %v2228_v11, %v2224_v35  ;;  %1789 = vadd.xlane.f32.xlu1 %v1788_v30  ;;  %1744 = vadd.xlane.f32.xlu0 %v1743_v63  ;;  %vm2642_vm14 = vcmask 1042434   ;;  %v1794_v63 = vsel %vm1463_vm0, %v1445_v19, 0.0  ;;  %v1460_v35 = vmul.f32 %v3200_v50, %v1332_v9  ;;  %p3446_p4 = pnand %p3445_p3, %p3630_p8  ;;  %p3453_p10 = por %p3452_p7, %p3451_p6 }
 0x143   : > { %v1607_v18 = vpop.xlane.xlu1 %1606  ;;  %v2234_v1 = vsel %vm2071_vm15, %v2233_v25, %v2229_v48  ;;  %v1604_v0 = vpop.xlane.xlu0 %1603  ;;  %v1797_v11 = vsel %vm1463_vm0, %v1446_v15, 0.0  ;;  %v1462_v31 = vmul.f32 %v3204_v62, %v1334_v34 }
 0x144   : > { %v2243_v6 = vrot.slane %v1607_v18, %v4417_v58  ;;  %v2238_v26 = vrot.slane %v1604_v0, %v4420_v39  ;;  %v1839_v48 = vsel %vm1463_vm0, %v1460_v35, 0.0  ;;  %p3447_p5 = pneg %p3446_p4 }
 0x145   : > { %v1845_v52 = vsel %vm1463_vm0, %v1462_v31, 0.0 }
 0x146   : > { %v2239_v3 = vsel %vm2078_vm1, %v2238_v26, %v2234_v1  ;;  %1747 = vadd.xlane.f32.xlu1 %v1746_v42  ;;  %1834 = vadd.xlane.f32.xlu0 %v1833_v37  ;;  %v1461_v42 = vmul.f32 %v3203_v13, %v1333_v17  ;;  %p3454_p11 = pnand %p3453_p10, %p3447_p5 }
 0x147   : > { %v2244_v54 = vsel %vm2085_vm2, %v2243_v6, %v2239_v3  ;;  %v1613_v16 = vpop.xlane.xlu1 %1612  ;;  %v1610_v28 = vpop.xlane.xlu0 %1609 }
 0x148   : > { %v4712_v27 = vsel %vm2642_vm14, %v2244_v54, %v4587_v29  ;;  %v2252_v53 = vrot.slane %v1613_v16, %v4258_v14  ;;  %v2248_v59 = vrot.slane %v1610_v28, %v4241_v7  ;;  %v1749_v29 = vsel %vm1463_vm0, %v1430_v5, 0.0 }
 0x149   : > { %v1842_v23 = vsel %vm1463_vm0, %v1461_v42, 0.0  ;;  %vm4992_vm0 = vcmask 851712   ;;  %vm2644_vm14 = vcmask 1043459  }
 0x14a   : > { %v2253_v30 = vsel %vm1987_vm3, %v2252_v53, %v2248_v59  ;;  %1837 = vadd.xlane.f32.xlu1 %v1836_v45  ;;  %1792 = vadd.xlane.f32.xlu0 %v1791_v33 }
 0x14b   : > { %v1619_v40 = vpop.xlane.xlu1 %1618  ;;  %v1616_v44 = vpop.xlane.xlu0 %1615 }
 0x14c   : > { %v2262_v36 = vrot.slane %v1619_v40, %v4252_v20  ;;  %v2257_v46 = vrot.slane %v1616_v44, %v4237_v4 }
 0x14e   : > { %v2258_v25 = vsel %vm1994_vm4, %v2257_v46, %v2253_v30  ;;  %1795 = vadd.xlane.f32.xlu1 %v1794_v63  ;;  %1750 = vadd.xlane.f32.xlu0 %v1749_v29 }
 0x14f   : > { %v1625_v49 = vpop.xlane.xlu1 %1624  ;;  %v2263_v24 = vsel %vm2001_vm5, %v2262_v36, %v2258_v25  ;;  %v1622_v47 = vpop.xlane.xlu0 %1621 }
 0x150   : > { %v2272_v57 = vrot.slane %v1625_v49, %v4264_v32  ;;  %v2267_v8 = vrot.slane %v1622_v47, %v4273_v41 }
 0x152   : > { %v2268_v18 = vsel %vm2008_vm6, %v2267_v8, %v2263_v24  ;;  %1798 = vadd.xlane.f32.xlu1 %v1797_v11  ;;  %1840 = vadd.xlane.f32.xlu0 %v1839_v48 }
 0x153   : > { %v1631_v1 = vpop.xlane.xlu1 %1630  ;;  %v2273_v0 = vsel %vm2015_vm7, %v2272_v57, %v2268_v18  ;;  %v1628_v37 = vpop.xlane.xlu0 %1627 }
 0x154   : > { %v2282_v10 = vrot.slane %v1631_v1, %v4280_v21  ;;  %v2277_v6 = vrot.slane %v1628_v37, %v4287_v38 }
 0x156   : > { %v2278_v26 = vsel %vm2022_vm8, %v2277_v6, %v2273_v0  ;;  %1843 = vadd.xlane.f32.xlu0 %v1842_v23  ;;  %1846 = vadd.xlane.f32.xlu1 %v1845_v52 }
 0x157   : > { %v1637_v45 = vpop.xlane.xlu1 %1636  ;;  %v2283_v56 = vsel %vm2029_vm9, %v2282_v10, %v2278_v26  ;;  %v1634_v3 = vpop.xlane.xlu0 %1633 }
 0x158   : > { %v2292_v19 = vrot.slane %v1637_v45, %v4299_v55  ;;  %v2287_v22 = vrot.slane %v1634_v3, %v4311_v61 }
 0x15a   : > { %v2288_v50 = vsel %vm2036_vm10, %v2287_v22, %v2283_v56 }
 0x15b   : > { %v1643_v12 = vpop.xlane.xlu1 %1642  ;;  %v2293_v54 = vsel %vm2043_vm11, %v2292_v19, %v2288_v50  ;;  %v1640_v16 = vpop.xlane.xlu0 %1639 }
 0x15c   : > { %v2302_v28 = vrot.slane %v1643_v12, %v4345_v43  ;;  %v2297_v33 = vrot.slane %v1640_v16, %v4370_v51 }
 0x15e   : > { %v2298_v5 = vsel %vm2050_vm12, %v2297_v33, %v2293_v54 }
 0x15f   : > { %v1649_v9 = vpop.xlane.xlu1 %1648  ;;  %v2303_v53 = vsel %vm2057_vm13, %v2302_v28, %v2298_v5  ;;  %v1646_v59 = vpop.xlane.xlu0 %1645 }
 0x160   : > { %v2312_v13 = vrot.slane %v1649_v9, %v4377_v60  ;;  %v2307_v30 = vrot.slane %v1646_v59, %v4380_v2 }
 0x162   : > { %v2308_v63 = vsel %vm4992_vm0, %v2307_v30, %v2303_v53 }
 0x163   : > { %v1655_v15 = vpop.xlane.xlu1 %1654  ;;  %v2313_v17 = vsel %vm2071_vm15, %v2312_v13, %v2308_v63  ;;  %v1652_v40 = vpop.xlane.xlu0 %1651 }
 0x164   : > { %v2322_v44 = vrot.slane %v1655_v15, %v4417_v58  ;;  %v2317_v29 = vrot.slane %v1652_v40, %v4420_v39 }
 0x166   : > { %v2318_v35 = vsel %vm2078_vm1, %v2317_v29, %v2313_v17 }
 0x167   : > { %v2323_v62 = vsel %vm2085_vm2, %v2322_v44, %v2318_v35  ;;  %v1661_v34 = vpop.xlane.xlu1 %1660  ;;  %v1658_v36 = vpop.xlane.xlu0 %1657 }
 0x168   : > { %v2645_v46 = vsel %vm2644_vm14, %v2323_v62, %v4712_v27  ;;  %v2331_v25 = vrot.slane %v1661_v34, %v4258_v14  ;;  %v2327_v11 = vrot.slane %v1658_v36, %v4241_v7  ;;  %vm2646_vm14 = vcmask 1044484  }
 0x16a   : > { %v2332_v49 = vsel %vm1987_vm3, %v2331_v25, %v2327_v11 }
 0x16b   : > { %v1667_v24 = vpop.xlane.xlu1 %1666  ;;  %v1664_v47 = vpop.xlane.xlu0 %1663 }
 0x16c   : > { %v2341_v48 = vrot.slane %v1667_v24, %v4252_v20  ;;  %v2336_v42 = vrot.slane %v1664_v47, %v4237_v4 }
 0x16e   : > { %v2337_v31 = vsel %vm1994_vm4, %v2336_v42, %v2332_v49 }
 0x16f   : > { %v1673_v57 = vpop.xlane.xlu1 %1672  ;;  %v2342_v8 = vsel %vm2001_vm5, %v2341_v48, %v2337_v31  ;;  %v1670_v18 = vpop.xlane.xlu0 %1669 }
 0x170   : > { %v2351_v27 = vrot.slane %v1673_v57, %v4264_v32  ;;  %v2346_v1 = vrot.slane %v1670_v18, %v4273_v41 }
 0x172   : > { %v2347_v0 = vsel %vm2008_vm6, %v2346_v1, %v2342_v8 }
 0x173   : > { %v1679_v37 = vpop.xlane.xlu1 %1678  ;;  %v2352_v23 = vsel %vm2015_vm7, %v2351_v27, %v2347_v0  ;;  %v1676_v52 = vpop.xlane.xlu0 %1675 }
 0x174   : > { %v2361_v10 = vrot.slane %v1679_v37, %v4280_v21  ;;  %v2356_v6 = vrot.slane %v1676_v52, %v4287_v38 }
 0x176   : > { %v2357_v26 = vsel %vm2022_vm8, %v2356_v6, %v2352_v23 }
 0x177   : > { %v1685_v45 = vpop.xlane.xlu1 %1684  ;;  %v2362_v56 = vsel %vm2029_vm9, %v2361_v10, %v2357_v26  ;;  %v1682_v3 = vpop.xlane.xlu0 %1681 }
 0x178   : > { %v2371_v19 = vrot.slane %v1685_v45, %v4299_v55  ;;  %v2366_v22 = vrot.slane %v1682_v3, %v4311_v61 }
 0x17a   : > { %v2367_v50 = vsel %vm2036_vm10, %v2366_v22, %v2362_v56 }
 0x17b   : > { %v1691_v12 = vpop.xlane.xlu1 %1690  ;;  %v2372_v54 = vsel %vm2043_vm11, %v2371_v19, %v2367_v50  ;;  %v1688_v16 = vpop.xlane.xlu0 %1687 }
 0x17c   : > { %v2381_v28 = vrot.slane %v1691_v12, %v4345_v43  ;;  %v2376_v33 = vrot.slane %v1688_v16, %v4370_v51 }
 0x17e   : > { %v2377_v5 = vsel %vm2050_vm12, %v2376_v33, %v2372_v54 }
 0x17f   : > { %v1697_v9 = vpop.xlane.xlu1 %1696  ;;  %v2382_v53 = vsel %vm2057_vm13, %v2381_v28, %v2377_v5  ;;  %v1694_v59 = vpop.xlane.xlu0 %1693 }
 0x180   : > { %v2391_v13 = vrot.slane %v1697_v9, %v4377_v60  ;;  %v2386_v30 = vrot.slane %v1694_v59, %v4380_v2 }
 0x182   : > { %v2387_v63 = vsel %vm4992_vm0, %v2386_v30, %v2382_v53 }
 0x183   : > { %v1703_v15 = vpop.xlane.xlu1 %1702  ;;  %v2392_v17 = vsel %vm2071_vm15, %v2391_v13, %v2387_v63  ;;  %v1700_v40 = vpop.xlane.xlu0 %1699 }
 0x184   : > { %v2401_v44 = vrot.slane %v1703_v15, %v4417_v58  ;;  %v2396_v29 = vrot.slane %v1700_v40, %v4420_v39 }
 0x186   : > { %v2397_v35 = vsel %vm2078_vm1, %v2396_v29, %v2392_v17 }
 0x187   : > { %v2402_v62 = vsel %vm2085_vm2, %v2401_v44, %v2397_v35  ;;  %v1709_v34 = vpop.xlane.xlu1 %1708  ;;  %v1706_v36 = vpop.xlane.xlu0 %1705 }
 0x188   : > { %v2410_v25 = vrot.slane %v1709_v34, %v4258_v14  ;;  %v2406_v11 = vrot.slane %v1706_v36, %v4241_v7  ;;  %v4788_v49 = vsel %vm2646_vm14, %v2402_v62, %v2645_v46 }
 0x18a   : > { %v2411_v24 = vsel %vm1987_vm3, %v2410_v25, %v2406_v11 }
 0x18b   : > { %v1754_v47 = vpop.xlane.xlu1 %1753  ;;  %v1712_v48 = vpop.xlane.xlu0 %1711 }
 0x18c   : > { %v2415_v42 = vrot.slane %v1712_v48, %v4237_v4  ;;  %v2485_v18 = vrot.slane %v1754_v47, %v4241_v7 }
 0x18e   : > { %v2416_v31 = vsel %vm1994_vm4, %v2415_v42, %v2411_v24 }
 0x18f   : > { %v1715_v57 = vpop.xlane.xlu1 %1714  ;;  %v1757_v8 = vpop.xlane.xlu0 %1756 }
 0x190   : > { %v2420_v27 = vrot.slane %v1715_v57, %v4252_v20  ;;  %v2489_v1 = vrot.slane %v1757_v8, %v4258_v14 }
 0x192   : > { %v2421_v0 = vsel %vm2001_vm5, %v2420_v27, %v2416_v31  ;;  %v2490_v46 = vsel %vm1987_vm3, %v2489_v1, %v2485_v18  ;;  %v4800_v22 = vpop.f32.mrb[0].mxu0 }
 0x193   : > { %v1802_v37 = vpop.xlane.xlu1 %1801  ;;  %v1760_v23 = vpop.xlane.xlu0 %1759 }
 0x194   : > { %v2494_v52 = vrot.slane %v1760_v23, %v4237_v4  ;;  %v3319_v50 = vpop.f32.mrb[1].mxu0  ;;  %v2564_v48 = vrot.slane %v1802_v37, %v4241_v7 }
 0x196   : > { %v2495_v10 = vsel %vm1994_vm4, %v2494_v52, %v2490_v46 }
 0x197   : > { %v1718_v6 = vpop.xlane.xlu1 %1717  ;;  %v1805_v26 = vpop.xlane.xlu0 %1804 }
 0x198   : > { %v2568_v11 = vrot.slane %v1805_v26, %v4258_v14  ;;  %v2425_v24 = vrot.slane %v1718_v6, %v4273_v41 }
 0x19a   : > { %v2569_v27 = vsel %vm1987_vm3, %v2568_v11, %v2564_v48  ;;  %v2426_v46 = vsel %vm2008_vm6, %v2425_v24, %v2421_v0  ;;  %vm2648_vm3 = vcmask 1045509  }
 0x19b   : > { %v1808_v45 = vpop.xlane.xlu1 %1807  ;;  %v1763_v56 = vpop.xlane.xlu0 %1762 }
 0x19c   : > { %v2573_v47 = vrot.slane %v1808_v45, %v4237_v4  ;;  %v2499_v42 = vrot.slane %v1763_v56, %v4252_v20 }
 0x19e   : > { %v2574_v4 = vsel %vm1994_vm4, %v2573_v47, %v2569_v27  ;;  %v2500_v23 = vsel %vm2001_vm5, %v2499_v42, %v2495_v10  ;;  %vm2650_vm4 = vcmask 1046534  }
 0x19f   : > { %v1766_v3 = vpop.xlane.xlu1 %1765  ;;  %v1721_v19 = vpop.xlane.xlu0 %1720 }
 0x1a0   : > { %v2504_v8 = vrot.slane %v1766_v3, %v4273_v41  ;;  %v2430_v18 = vrot.slane %v1721_v19, %v4264_v32 }
 0x1a2   : > { %v2431_v0 = vsel %vm2015_vm7, %v2430_v18, %v2426_v46 }
 0x1a3   : > { %v1724_v12 = vpop.xlane.xlu1 %1723  ;;  %v1811_v54 = vpop.xlane.xlu0 %1810 }
 0x1a4   : > { %v2435_v1 = vrot.slane %v1724_v12, %v4287_v38  ;;  %v2578_v14 = vrot.slane %v1811_v54, %v4252_v20  ;;  %v2505_v20 = vsel %vm2008_vm6, %v2504_v8, %v2500_v23 }
 0x1a6   : > { %v2436_v10 = vsel %vm2022_vm8, %v2435_v1, %v2431_v0 }
 0x1a7   : > { %v1814_v16 = vpop.xlane.xlu1 %1813  ;;  %v1769_v28 = vpop.xlane.xlu0 %1768 }
 0x1a8   : > { %v2509_v7 = vrot.slane %v1769_v28, %v4264_v32  ;;  %v2583_v52 = vrot.slane %v1814_v16, %v4273_v41  ;;  %v2579_v41 = vsel %vm2001_vm5, %v2578_v14, %v2574_v4  ;;  %vm4993_vm5 = vmmov %vm4992_vm0 }
 0x1aa   : > { %v2510_v54 = vsel %vm2015_vm7, %v2509_v7, %v2505_v20 }
 0x1ab   : > { %v1772_v33 = vpop.xlane.xlu1 %1771  ;;  %v1727_v5 = vpop.xlane.xlu0 %1726 }
 0x1ac   : > { %v2440_v37 = vrot.slane %v1727_v5, %v4280_v21  ;;  %v2514_v6 = vrot.slane %v1772_v33, %v4287_v38  ;;  %v2584_v33 = vsel %vm2008_vm6, %v2583_v52, %v2579_v41  ;;  %vm4994_vm6 = vmmov %vm4992_vm0 }
 0x1ae   : > { %v2441_v16 = vsel %vm2029_vm9, %v2440_v37, %v2436_v10  ;;  %v2515_v5 = vsel %vm2022_vm8, %v2514_v6, %v2510_v54 }
 0x1af   : > { %v1730_v9 = vpop.xlane.xlu1 %1729  ;;  %v1817_v53 = vpop.xlane.xlu0 %1816 }
 0x1b0   : > { %v2445_v26 = vrot.slane %v1730_v9, %v4311_v61  ;;  %v2588_v3 = vrot.slane %v1817_v53, %v4264_v32 }
 0x1b2   : > { %v2446_v9 = vsel %vm2036_vm10, %v2445_v26, %v2441_v16 }
 0x1b3   : > { %v4802_v59 = vpop.xlane.xlu1 %1819  ;;  %v1775_v13 = vpop.xlane.xlu0 %1774 }
 0x1b4   : > { %v2519_v50 = vrot.slane %v1775_v13, %v4280_v21  ;;  %v2593_v42 = vrot.slane %v4802_v59, %v4287_v38 }
 0x1b7   : > { %v4804_v30 = vpop.xlane.xlu1 %1777  ;;  %v1733_v63 = vpop.xlane.xlu0 %1732 }
 0x1b8   : > { %v2450_v19 = vrot.slane %v1733_v63, %v4299_v55  ;;  %v2524_v28 = vrot.slane %v4804_v30, %v4311_v61 }
 0x1ba   : > { %v2451_v11 = vsel %vm2043_vm11, %v2450_v19, %v2446_v9 }
 0x1bb   : > { %v1736_v15 = vpop.xlane.xlu1 %1735  ;;  %v4806_v17 = vpop.xlane.xlu0 %1822 }
 0x1bc   : > { %v2455_v12 = vrot.slane %v1736_v15, %v4370_v51  ;;  %v2589_v15 = vsel %vm2015_vm7, %v2588_v3, %v2584_v33  ;;  %vm4995_vm7 = vmmov %vm4992_vm0 }
 0x1be   : > { %v2456_v47 = vsel %vm2050_vm12, %v2455_v12, %v2451_v11 }
 0x1bf   : > { %v4808_v40 = vpop.xlane.xlu1 %1825  ;;  %v4810_v44 = vpop.xlane.xlu0 %1780 }
 0x1c0   : > { %v2529_v24 = vrot.slane %v4810_v44, %v4299_v55  ;;  %v2603_v27 = vrot.slane %v4808_v40, %v4311_v61 }
 0x1c3   : > { %v4812_v29 = vpop.xlane.xlu1 %1783  ;;  %v1739_v35 = vpop.xlane.xlu0 %1738 }
 0x1c4   : > { %v2460_v32 = vrot.slane %v1739_v35, %v4345_v43  ;;  %v2520_v35 = vsel %vm2029_vm9, %v2519_v50, %v2515_v5  ;;  %v2534_v48 = vrot.slane %v4812_v29, %v4370_v51 }
 0x1c5   : > { %v2525_v8 = vsel %vm2036_vm10, %v2524_v28, %v2520_v35 }
 0x1c6   : > { %v2461_v18 = vsel %vm2057_vm13, %v2460_v32, %v2456_v47  ;;  %v2530_v59 = vsel %vm2043_vm11, %v2529_v24, %v2525_v8 }
 0x1c7   : > { %v1742_v62 = vpop.xlane.xlu1 %1741  ;;  %v4814_v34 = vpop.xlane.xlu0 %1828 }
 0x1c8   : > { %v2465_v53 = vrot.slane %v1742_v62, %v4380_v2  ;;  %v2608_v61 = vrot.slane %v4814_v34, %v4299_v55 }
 0x1ca   : > { %v2466_v29 = vsel %vm4993_vm5, %v2465_v53, %v2461_v18 }
 0x1cb   : > { %v4816_v36 = vpop.xlane.xlu1 %1831  ;;  %v4818_v25 = vpop.xlane.xlu0 %1786 }
 0x1cc   : > { %v2539_v44 = vrot.slane %v4818_v25, %v4345_v43  ;;  %v2613_v7 = vrot.slane %v4816_v36, %v4370_v51 }
 0x1cf   : > { %v4825_v31 = vpop.xlane.xlu1 %1789  ;;  %v1745_v57 = vpop.xlane.xlu0 %1744 }
 0x1d0   : > { %v2470_v30 = vrot.slane %v1745_v57, %v4377_v60  ;;  %v2598_v57 = vrot.slane %v4806_v17, %v4280_v21  ;;  %v2544_v1 = vrot.slane %v4825_v31, %v4380_v2  ;;  %v2535_v21 = vsel %vm2050_vm12, %v2534_v48, %v2530_v59 }
 0x1d1   : > { %v2594_v31 = vsel %vm2022_vm8, %v2593_v42, %v2589_v15  ;;  %v2540_v37 = vsel %vm2057_vm13, %v2539_v44, %v2535_v21  ;;  %vm2652_vm8 = vcmask 1047559  }
 0x1d2   : > { %v2471_v46 = vsel %vm2071_vm15, %v2470_v30, %v2466_v29  ;;  %v2599_v52 = vsel %vm2029_vm9, %v2598_v57, %v2594_v31  ;;  %v2545_v6 = vsel %vm4994_vm6, %v2544_v1, %v2540_v37 }
 0x1d3   : > { %v1748_v45 = vpop.xlane.xlu1 %1747  ;;  %v4840_v56 = vpop.xlane.xlu0 %1834  ;;  %v2604_v20 = vsel %vm2036_vm10, %v2603_v27, %v2599_v52 }
 0x1d4   : > { %v2475_v62 = vrot.slane %v1748_v45, %v4420_v39  ;;  %v2618_v55 = vrot.slane %v4840_v56, %v4345_v43  ;;  %v2609_v3 = vsel %vm2043_vm11, %v2608_v61, %v2604_v20 }
 0x1d5   : > { %v2614_v19 = vsel %vm2050_vm12, %v2613_v7, %v2609_v3 }
 0x1d6   : > { %v2476_v17 = vsel %vm2078_vm1, %v2475_v62, %v2471_v46  ;;  %v2619_v10 = vsel %vm2057_vm13, %v2618_v55, %v2614_v19 }
 0x1d7   : > { %v1838_v13 = vpop.xlane.xlu1 %1837  ;;  %v1793_v63 = vpop.xlane.xlu0 %1792 }
 0x1d8   : > { %v2549_v4 = vrot.slane %v1793_v63, %v4377_v60  ;;  %v2623_v51 = vrot.slane %v1838_v13, %v4380_v2 }
 0x1da   : > { %v2550_v36 = vsel %vm2071_vm15, %v2549_v4, %v2545_v6  ;;  %v2624_v12 = vsel %vm4995_vm7, %v2623_v51, %v2619_v10 }
 0x1db   : > { %v1796_v14 = vpop.xlane.xlu1 %1795  ;;  %v1751_v38 = vpop.xlane.xlu0 %1750 }
 0x1dc   : > { %v2480_v25 = vrot.slane %v1751_v38, %v4417_v58  ;;  %v2554_v40 = vrot.slane %v1796_v14, %v4420_v39 }
 0x1de   : > { %v2481_v23 = vsel %vm2085_vm2, %v2480_v25, %v2476_v17  ;;  %v2555_v43 = vsel %vm2078_vm1, %v2554_v40, %v2550_v36 }
 0x1df   : > { %v1799_v34 = vpop.xlane.xlu1 %1798  ;;  %v1841_v26 = vpop.xlane.xlu0 %1840  ;;  %v2649_v45 = vsel %vm2648_vm3, %v2481_v23, %v4788_v49 }
 0x1e0   : > { %v2559_v0 = vrot.slane %v1799_v34, %v4417_v58  ;;  %v2628_v56 = vrot.slane %v1841_v26, %v4377_v60 }
 0x1e2   : > { %v2560_v49 = vsel %vm2085_vm2, %v2559_v0, %v2555_v43  ;;  %v2629_v60 = vsel %vm2071_vm15, %v2628_v56, %v2624_v12 }
 0x1e3   : > { %v1844_v41 = vpop.xlane.xlu0 %1843  ;;  %v1847_v2 = vpop.xlane.xlu1 %1846  ;;  %v2651_v50 = vsel %vm2650_vm4, %v2560_v49, %v2649_v45 }
 0x1e4   : > { %v2633_v54 = vrot.slane %v1844_v41, %v4420_v39  ;;  %v2638_v16 = vrot.slane %v1847_v2, %v4417_v58 }
 0x1e6   : > { %v2634_v28 = vsel %vm2078_vm1, %v2633_v54, %v2629_v60 }
 0x1e7   : > { %v2639_v32 = vsel %vm2085_vm2, %v2638_v16, %v2634_v28 }
 0x1e8   : > { %v2653_v33 = vsel %vm2652_vm8, %v2639_v32, %v2651_v50 }
 0x1e9   : > { %v2772_v5 = vadd.f32 %v4800_v22, %v2653_v33 }
 0x1eb   : > { %2775 = vst [vmem:[%s809_s13] sm:$0xff] %v2772_v5 }
 0x1ec   : > { %3457 = shalt.err (!%p3454_p11)
}
 0x1ed   : > { %s3458_s5 = scalar_lea.hbm %s4926_s24, 128  ;;  %s3462_s12 = scalar_lea.hbm %s4984_s4, 512 }
 0x1ee   : > { %p3459_p12 = scmp.ne.s32.totalorder %s4926_s24, %s3458_s5  ;;  %p3463_p1 = scmp.lt.u32.totalorder %s4926_s24, %s4984_s4 }
 0x1ef   : > { %p3464_p2 = scmp.lt.u32.totalorder %s3462_s12, %s3458_s5  ;;  %p3466_p4 = scmp.lt.u32.totalorder %s3458_s5, %s4926_s24 }
 0x1f0   : > { %p3460_p13 = pnand %p3459_p12, %p3630_p8 }
 0x1f1   : > { %p3465_p3 = por %p3464_p2, %p3463_p1 }
 0x1f2   : > { %p3461_p0 = pneg %p3460_p13 }
 0x1f3   : > { %p3467_p5 = por %p3466_p4, %p3465_p3 }
 0x1f5   : > { %p3468_p6 = pnand %p3467_p5, %p3461_p0 }
 0x1f7   : > { %3471 = shalt.err (!%p3468_p6)
}
 0x1f8   : > { %3352 = dma.vmem_to_hbm [thread:$0]  (%p3630_p8), %s4928_s14, 128, %s4926_s24, %s2777_s27  }
 0x1f9 PF: > { %p3358_p7 = scmp.ge.s32.totalorder %s3538_s22, 2  ;;  %s2804_s18 = sand.u32 1, %s3510_s15  }
 0x1fa   : > { %s2805_s23 = scalar_lea.sflag [#allocation4], %s2804_s18 }
 0x1fb   : > { %p3355_p10 = pnand %p3358_p7, %p3634_p9 }
 0x1fd   : > { %3505 = dma.done.wait (!%p3355_p10), %s2805_s23, 128  }
 0x1fe   : > { %3507 = vsyncadd (!%p3355_p10), %s2805_s23, 4294967168  ;;  %s17_s22 = sadd.s32 1, %s3538_s22   ;;  %s4996_s15 = smov %s3514_s16 }
 0x1ff   : > { %p14_p11 = scmp.ge.s32.totalorder %s17_s22, 6   ;;  %s4997_s16 = smov %s3518_s17 }
 0x200   : > { %s4998_s17 = smov %s3642_s8  ;;  %s4999_s18 = smov %s3530_s20 }
 0x201   : > { %s5000_s19 = smov %s3534_s21  ;;  %s5001_s20 = smov %s5004_s25 }
 0x202   : > { %s5002_s21 = smov %s5008_s26  ;;  %16 = sbr.rel (!%p14_p11) target bundleno = 5 (0x5), region = 126 }
 0x209   :  { %2810 = vsyncpa [#allocation4], 1 }
 0x20a   :  { %2812 = vsyncpa [#allocation4 + $0x1], 1 }

</bundles_post_ra>
